<compile_context>
chip_gen: v6e
topology: v6e:2x2x1
jax: 0.10.0
libtpu: 0.0.40
codegen_flags: <defaults>
</compile_context>

<pallas_src>
import functools

import jax
import jax.numpy as jnp
from jax.experimental import pallas as pl
from jax.experimental.pallas import tpu as pltpu


def _round_up(x, m):
    return (x + m - 1) // m * m


# ---------------------------------------------------------------------------
# In-kernel helper: KxK 'same' conv as ONE im2col matmul
# ---------------------------------------------------------------------------
def _conv_im2col(zm_ref, row0, cp, slab_ref, w_ref, b_ref, mhw_ref, mrow0,
                 *, K, W, HW):
    """KxK stride-1 'same' conv over a zero-padded flat intermediate.

    zm_ref : (cp2+cp3, Lx) VMEM scratch; rows [row0, row0+cp) hold this
             branch's 1x1 output laid out like the padded input (image
             interior at flat offset 2*W+2, everything else exactly zero).
    slab_ref: (K*K*cp, HW) VMEM scratch -- the full im2col slab.
    w_ref  : (Cout, K*K*cp), column order (dy, dx, c).
    mhw_ref: packed masks; rows [mrow0, mrow0+K) are per-dx column validity
             masks (kill the W wrap-around of the flat layout).
    Returns (Cout, HW) float32 with bias + ReLU applied.
    """
    off0 = 2 - (K - 1) // 2                 # flat offset of tap (dy=0, dx=0)
    for dy in range(K):
        for dx in range(K):
            s = (dy + off0) * W + (dx + off0)
            tap = zm_ref[row0:row0 + cp, s:s + HW]
            cm = mhw_ref[mrow0 + dx:mrow0 + dx + 1, :]
            r0 = (dy * K + dx) * cp          # multiple of 8 -> aligned store
            slab_ref[r0:r0 + cp, :] = tap * cm
    acc = jnp.dot(w_ref[...], slab_ref[...],
                  preferred_element_type=jnp.float32)
    return jnp.maximum(acc + b_ref[...], 0.0)


# ---------------------------------------------------------------------------
# Fused Inception kernel (one grid step == one batch element)
# ---------------------------------------------------------------------------
def _inception_kernel(
    x_ref,                     # (Cin, Lx) flattened input, H-pad 2, flat-pad 2
    mhw_ref,                   # (16, HW): [0:3]=3x3 col mask, [3:8]=5x5 col
                               #           mask, [8:16]=maxpool additive mask
    w11_ref, b11_ref,          # (cp2+cp3+c1, Cin), (cp2+cp3+c1, 1)
    w22_ref, b22_ref,          # (c2_1, 9*cp2),  (c2_1, 1)
    w32_ref, b32_ref,          # (c3_1, 25*cp3), (c3_1, 1)
    w4_ref, b4_ref,            # (c4, Cin), (c4, 1)
    o_ref,                     # (c1+c2_1+c3_1+c4, HW) fused output
    zm_ref, slab3_ref, slab5_ref,      # VMEM scratch
    *, H, W, cp2, cp3,
):
    HW = H * W
    Lx = x_ref.shape[1]
    base = 2 * W + 2                       # flat index of image pixel (0, 0)
    c1 = w11_ref.shape[0] - cp2 - cp3
    c2_1 = w22_ref.shape[0]
    c3_1 = w32_ref.shape[0]

    # ---- merged 1x1 convs on x: branch-2 reducer, branch-3 reducer, branch 1
    z = jnp.dot(w11_ref[...], x_ref[...],
                preferred_element_type=jnp.float32)       # (cp2+cp3+c1, Lx)
    z = jnp.maximum(z + b11_ref[...], 0.0)

    # Zero everything outside the image interior so the KxK convs see exact
    # zero padding (relu(bias) at pad positions must vanish).
    pos = jax.lax.broadcasted_iota(jnp.int32, (1, Lx), 1)
    interior = (pos >= base) & (pos < base + HW)
    zm_ref[...] = jnp.where(interior, z[0:cp2 + cp3, :], 0.0).astype(zm_ref.dtype)

    # ---- branch 1: 1x1 + ReLU (interior columns of z's last c1 rows) -----
    y1 = z[cp2 + cp3:cp2 + cp3 + c1, base:base + HW]

    # ---- branch 2: 1x1 -> ReLU -> 3x3 -> ReLU -----------------------------
    y2 = _conv_im2col(zm_ref, 0, cp2, slab3_ref, w22_ref, b22_ref,
                      mhw_ref, 0, K=3, W=W, HW=HW)

    # ---- branch 3: 1x1 -> ReLU -> 5x5 -> ReLU -----------------------------
    y3 = _conv_im2col(zm_ref, cp2, cp3, slab5_ref, w32_ref, b32_ref,
                      mhw_ref, 3, K=5, W=W, HW=HW)

    # ---- branch 4: 3x3 maxpool (stride 1, pad 1) -> 1x1 -> ReLU ------------
    acc = x_ref[:, base:base + HW]                 # center tap, always valid
    t = 0
    for dy in range(3):
        for dx in range(3):
            if dy == 1 and dx == 1:
                continue
            s = (dy + 1) * W + (dx + 1)
            acc = jnp.maximum(acc,
                              x_ref[:, s:s + HW] + mhw_ref[8 + t:9 + t, :])
            t += 1
    y4 = jnp.dot(w4_ref[...], acc, preferred_element_type=jnp.float32)
    y4 = jnp.maximum(y4 + b4_ref[...], 0.0)

    # ---- fused output: torch.cat channel order (c1, c2_1, c3_1, c4) -------
    o_ref[0:c1, :] = y1.astype(o_ref.dtype)
    o_ref[c1:c1 + c2_1, :] = y2.astype(o_ref.dtype)
    o_ref[c1 + c2_1:c1 + c2_1 + c3_1, :] = y3.astype(o_ref.dtype)
    o_ref[c1 + c2_1 + c3_1:, :] = y4.astype(o_ref.dtype)


# ---------------------------------------------------------------------------
# Wrapper: packing, masks, pallas_call
# ---------------------------------------------------------------------------
@jax.jit
def inception_forward(x, params):
    """x: (N, Cin, H, W) NCHW.  params: HWIO weights / 1D biases."""
    N, Cin, H, W = x.shape
    HW = H * W
    dt = x.dtype

    c1 = params["b1_1_w"].shape[-1]
    c2_0, c2_1 = params["b2_1_w"].shape[-1], params["b2_2_w"].shape[-1]
    c3_0, c3_1 = params["b3_1_w"].shape[-1], params["b3_2_w"].shape[-1]
    c4 = params["b4_2_w"].shape[-1]
    cp2 = _round_up(c2_0, 8)               # pad reducer channels to 8 so the
    cp3 = _round_up(c3_0, 8)               # im2col tap rows stay 8-aligned
    ctot = c1 + c2_1 + c3_1 + c4

    Lx = (H + 4) * W + 4                   # flat length of the padded input

    # ---- flatten + pad the input once (H-pad 2 rows, flat-pad 2 elems) ----
    xh = jnp.pad(x, ((0, 0), (0, 0), (2, 2), (0, 0)))
    x_flat = jnp.pad(xh.reshape(N, Cin, (H + 4) * W), ((0, 0), (0, 0), (2, 2)))

    # ---- packed masks: ONE (16, HW) operand --------------------------------
    col = (jnp.arange(HW, dtype=jnp.int32) % W)[None, :]
    row = (jnp.arange(HW, dtype=jnp.int32) // W)[None, :]

    def col_mask(K, P):
        dx = jnp.arange(K, dtype=jnp.int32)[:, None]
        return ((col >= P - dx) & (col < W + P - dx)).astype(dt)

    pool_rows = []
    for dy in range(3):
        for dx in range(3):
            if dy == 1 and dx == 1:
                continue
            ok = ((row >= 1 - dy) & (row < H + 1 - dy)
                  & (col >= 1 - dx) & (col < W + 1 - dx))
            pool_rows.append(jnp.where(ok, 0.0, -1e30).astype(dt))
    masks_hw = jnp.concatenate([col_mask(3, 1), col_mask(5, 2)] + pool_rows,
                               axis=0)                           # (16, HW)

    # ---- pack weights as (Cout, taps*Cin) matmul LHS -----------------------
    def pack_1x1(w, b, cpad=None):
        cin, cout = w.shape[2], w.shape[3]
        wm = w.reshape(cin, cout).T
        bm = b.reshape(cout, 1)
        if cpad is not None and cpad != cout:
            wm = jnp.pad(wm, ((0, cpad - cout), (0, 0)))
            bm = jnp.pad(bm, ((0, cpad - cout), (0, 0)))
        return wm, bm

    def pack_kxk(w, b, cin_pad):
        K, _, cin, cout = w.shape
        wp = jnp.pad(w, ((0, 0), (0, 0), (0, cin_pad - cin), (0, 0)))
        return wp.reshape(K * K * cin_pad, cout).T, b.reshape(cout, 1)

    w1, b1 = pack_1x1(params["b1_1_w"], params["b1_1_b"])
    w21, b21 = pack_1x1(params["b2_1_w"], params["b2_1_b"], cp2)
    w31, b31 = pack_1x1(params["b3_1_w"], params["b3_1_b"], cp3)
    # Stacked 1x1-on-x LHS: row order (cp2 reducer, cp3 reducer, c1) so the
    # row slices used in-kernel start at sublane-aligned offsets 0 / cp2 / cp2+cp3.
    w11 = jnp.concatenate([w21, w31, w1], axis=0).astype(dt)
    b11 = jnp.concatenate([b21, b31, b1], axis=0).astype(jnp.float32)
    w22, b22 = pack_kxk(params["b2_2_w"], params["b2_2_b"], cp2)
    w32, b32 = pack_kxk(params["b3_2_w"], params["b3_2_b"], cp3)
    w4, b4 = pack_1x1(params["b4_2_w"], params["b4_2_b"])
    w22, w32, w4 = w22.astype(dt), w32.astype(dt), w4.astype(dt)
    b22 = b22.astype(jnp.float32)
    b32 = b32.astype(jnp.float32)
    b4 = b4.astype(jnp.float32)

    def full2d(a):
        return pl.BlockSpec(a.shape, lambda n: (0, 0))

    in_specs = [
        pl.BlockSpec((None, Cin, Lx), lambda n: (n, 0, 0)),
        full2d(masks_hw),
        full2d(w11), full2d(b11),
        full2d(w22), full2d(b22),
        full2d(w32), full2d(b32),
        full2d(w4), full2d(b4),
    ]
    out_specs = pl.BlockSpec((None, ctot, HW), lambda n: (n, 0, 0))
    out_shape = jax.ShapeDtypeStruct((N, ctot, HW), dt)

    kernel = functools.partial(_inception_kernel, H=H, W=W, cp2=cp2, cp3=cp3)
    out = pl.pallas_call(
        kernel,
        grid=(N,),
        in_specs=in_specs,
        out_specs=out_specs,
        out_shape=out_shape,
        scratch_shapes=[pltpu.VMEM((cp2 + cp3, Lx), dt),     # masked 1x1 outs
                        pltpu.VMEM((9 * cp2, HW), dt),       # 3x3 im2col slab
                        pltpu.VMEM((25 * cp3, HW), dt)],     # 5x5 im2col slab
        compiler_params=pltpu.CompilerParams(
            dimension_semantics=("parallel",)),
    )(x_flat, masks_hw, w11, b11, w22, b22, w32, b32, w4, b4)

    return out.reshape(N, ctot, H, W)        # free reshape, no concat copy


# ---------------------------------------------------------------------------
# Pure-JAX reference (correctness check)
# ---------------------------------------------------------------------------
def _conv_ref(x, w, b, pad):
    y = jax.lax.conv_general_dilated(
        x, w, window_strides=(1, 1), padding=[(pad, pad), (pad, pad)],
        dimension_numbers=("NHWC", "HWIO", "NHWC"),
    )
    return jax.nn.relu(y + b)


def inception_ref(x_nchw, p):
    x = jnp.transpose(x_nchw, (0, 2, 3, 1))
    b1 = _conv_ref(x, p["b1_1_w"], p["b1_1_b"], 0)
    b2 = _conv_ref(_conv_ref(x, p["b2_1_w"], p["b2_1_b"], 0), p["b2_2_w"], p["b2_2_b"], 1)
    b3 = _conv_ref(_conv_ref(x, p["b3_1_w"], p["b3_1_b"], 0), p["b3_2_w"], p["b3_2_b"], 2)
    pool = jax.lax.reduce_window(
        x, -jnp.inf, jax.lax.max, (1, 3, 3, 1), (1, 1, 1, 1),
        padding=((0, 0), (1, 1), (1, 1), (0, 0)),
    )
    b4 = _conv_ref(pool, p["b4_2_w"], p["b4_2_b"], 0)
    out = jnp.concatenate([b1, b2, b3, b4], axis=-1)
    return jnp.transpose(out, (0, 3, 1, 2))


# ---------------------------------------------------------------------------
# Deterministic parameter init (HWIO weights, 1D biases)
# ---------------------------------------------------------------------------
def init_params(key, c_in, c1, c2, c3, c4):
    def conv_param(k, K, cin, cout):
        kw, kb = jax.random.split(k)
        scale = 1.0 / jnp.sqrt(jnp.float32(K * K * cin))
        w = jax.random.uniform(kw, (K, K, cin, cout), jnp.float32, -scale, scale)
        b = jax.random.uniform(kb, (cout,), jnp.float32, -scale, scale)
        return w, b

    keys = jax.random.split(key, 6)
    p = {}
    p["b1_1_w"], p["b1_1_b"] = conv_param(keys[0], 1, c_in, c1)
    p["b2_1_w"], p["b2_1_b"] = conv_param(keys[1], 1, c_in, c2[0])
    p["b2_2_w"], p["b2_2_b"] = conv_param(keys[2], 3, c2[0], c2[1])
    p["b3_1_w"], p["b3_1_b"] = conv_param(keys[3], 1, c_in, c3[0])
    p["b3_2_w"], p["b3_2_b"] = conv_param(keys[4], 5, c3[0], c3[1])
    p["b4_2_w"], p["b4_2_b"] = conv_param(keys[5], 1, c_in, c4)
    return p


if __name__ == "__main__":
    key = jax.random.PRNGKey(0)
    kx, kp = jax.random.split(key)

    N, C, H, W = 2, 4, 16, 16
    c1, c2, c3, c4 = 4, (4, 8), (4, 8), 4

    x = jax.random.normal(kx, (N, C, H, W), jnp.float32)
    params = init_params(kp, C, c1, c2, c3, c4)

    out = inception_forward(x, params)
    out = jax.block_until_ready(out)

    expected_channels = c1 + c2[1] + c3[1] + c4
    assert out.shape == (N, expected_channels, H, W), out.shape

    ref = jax.block_until_ready(inception_ref(x, params))
    assert jnp.allclose(out, ref, rtol=1e-4, atol=1e-4), float(
        jnp.max(jnp.abs(out - ref))
    )

    print("KERNEL_OK")
</pallas_src>

<mosaic_0001>
module attributes {stable_mosaic.version = 11 : i64} {
  func.func @_inception_kernel(%arg0: i32, %arg1: memref<1x4x324xf32, #tpu.memory_space<vmem>>, %arg2: memref<16x256xf32, #tpu.memory_space<vmem>>, %arg3: memref<20x4xf32, #tpu.memory_space<vmem>>, %arg4: memref<20x1xf32, #tpu.memory_space<vmem>>, %arg5: memref<8x72xf32, #tpu.memory_space<vmem>>, %arg6: memref<8x1xf32, #tpu.memory_space<vmem>>, %arg7: memref<8x200xf32, #tpu.memory_space<vmem>>, %arg8: memref<8x1xf32, #tpu.memory_space<vmem>>, %arg9: memref<4x4xf32, #tpu.memory_space<vmem>>, %arg10: memref<4x1xf32, #tpu.memory_space<vmem>>, %arg11: memref<1x24x256xf32, #tpu.memory_space<vmem>>, %arg12: memref<16x324xf32, #tpu.memory_space<vmem>>, %arg13: memref<72x256xf32, #tpu.memory_space<vmem>>, %arg14: memref<200x256xf32, #tpu.memory_space<vmem>>) attributes {dimension_semantics = [#tpu.dimension_semantics<parallel>], iteration_bounds = array<i64: 2>, scalar_prefetch = 0 : i64, scratch_operands = 3 : i64, tpu.core_type = #tpu.core_type<tc>, window_params = [{transform_indices = @transform_0, window_bounds = array<i64: 1, 4, 324>}, {pipeline_mode = #tpu.pipeline_mode<synchronous>, transform_indices = @transform_1, window_bounds = array<i64: 16, 256>}, {pipeline_mode = #tpu.pipeline_mode<synchronous>, transform_indices = @transform_2, window_bounds = array<i64: 20, 4>}, {pipeline_mode = #tpu.pipeline_mode<synchronous>, transform_indices = @transform_3, window_bounds = array<i64: 20, 1>}, {pipeline_mode = #tpu.pipeline_mode<synchronous>, transform_indices = @transform_4, window_bounds = array<i64: 8, 72>}, {pipeline_mode = #tpu.pipeline_mode<synchronous>, transform_indices = @transform_5, window_bounds = array<i64: 8, 1>}, {pipeline_mode = #tpu.pipeline_mode<synchronous>, transform_indices = @transform_6, window_bounds = array<i64: 8, 200>}, {pipeline_mode = #tpu.pipeline_mode<synchronous>, transform_indices = @transform_7, window_bounds = array<i64: 8, 1>}, {pipeline_mode = #tpu.pipeline_mode<synchronous>, transform_indices = @transform_8, window_bounds = array<i64: 4, 4>}, {pipeline_mode = #tpu.pipeline_mode<synchronous>, transform_indices = @transform_9, window_bounds = array<i64: 4, 1>}, {transform_indices = @transform_10, window_bounds = array<i64: 1, 24, 256>}]} {
    %c0 = arith.constant 0 : index
    %c0_0 = arith.constant 0 : index
    %0 = vector.load %arg3[%c0, %c0_0] : memref<20x4xf32, #tpu.memory_space<vmem>>, vector<20x4xf32>
    %c0_1 = arith.constant 0 : index
    %c0_2 = arith.constant 0 : index
    %c0_3 = arith.constant 0 : index
    %1 = vector.load %arg1[%c0_1, %c0_2, %c0_3] : memref<1x4x324xf32, #tpu.memory_space<vmem>>, vector<1x4x324xf32>
    %2 = vector.shape_cast %1 : vector<1x4x324xf32> to vector<4x324xf32>
    %cst = arith.constant dense<0.000000e+00> : vector<20x324xf32>
    %3 = tpu.matmul %0, %2, %cst {dimension_numbers = #tpu.dot_dimension_numbers<[1], [0], [0], [1], [0, 0, 1, 1], [], []>} : vector<20x4xf32>, vector<4x324xf32>, vector<20x324xf32> -> vector<20x324xf32>
    %c0_4 = arith.constant 0 : index
    %c0_5 = arith.constant 0 : index
    %4 = vector.load %arg4[%c0_4, %c0_5] : memref<20x1xf32, #tpu.memory_space<vmem>>, vector<20x1xf32>
    %5 = vector.broadcast %4 : vector<20x1xf32> to vector<20x324xf32>
    %6 = arith.addf %3, %5 : vector<20x324xf32>
    %cst_6 = arith.constant 0.000000e+00 : f32
    %7 = vector.broadcast %cst_6 : f32 to vector<20x324xf32>
    %8 = arith.maximumf %6, %7 : vector<20x324xf32>
    %9 = tpu.iota {dimensions = array<i32: 1>} : vector<1x324xi32>
    %c34_i32 = arith.constant 34 : i32
    %10 = vector.broadcast %c34_i32 : i32 to vector<1x324xi32>
    %11 = arith.cmpi sge, %9, %10 : vector<1x324xi32>
    %c290_i32 = arith.constant 290 : i32
    %12 = vector.broadcast %c290_i32 : i32 to vector<1x324xi32>
    %13 = arith.cmpi slt, %9, %12 : vector<1x324xi32>
    %14 = arith.andi %11, %13 : vector<1x324xi1>
    %15 = vector.extract_strided_slice %8 {offsets = [0, 0], sizes = [16, 324], strides = [1, 1]} : vector<20x324xf32> to vector<16x324xf32>
    %cst_7 = arith.constant 0.000000e+00 : f32
    %16 = vector.shape_cast %14 : vector<1x324xi1> to vector<1x324xi1>
    %17 = vector.broadcast %16 : vector<1x324xi1> to vector<16x324xi1>
    %18 = vector.broadcast %cst_7 : f32 to vector<16x324xf32>
    %19 = arith.select %17, %15, %18 : vector<16x324xi1>, vector<16x324xf32>
    %c0_8 = arith.constant 0 : index
    %c0_9 = arith.constant 0 : index
    %20 = vector.load %arg12[%c0_8, %c0_9] : memref<16x324xf32, #tpu.memory_space<vmem>>, vector<16x324xf32>
    tpu.vector_store %arg12[%c0_8, %c0_9], %19 {strides = array<i32>} : memref<16x324xf32, #tpu.memory_space<vmem>>, vector<16x324xf32>,
    %21 = vector.extract_strided_slice %8 {offsets = [16, 34], sizes = [4, 256], strides = [1, 1]} : vector<20x324xf32> to vector<4x256xf32>
    %c0_10 = arith.constant 0 : index
    %c17 = arith.constant 17 : index
    %22 = vector.load %arg12[%c0_10, %c17] : memref<16x324xf32, #tpu.memory_space<vmem>>, vector<8x256xf32>
    %c0_11 = arith.constant 0 : index
    %c0_12 = arith.constant 0 : index
    %23 = vector.load %arg2[%c0_11, %c0_12] : memref<16x256xf32, #tpu.memory_space<vmem>>, vector<1x256xf32>
    %24 = vector.broadcast %23 : vector<1x256xf32> to vector<8x256xf32>
    %25 = arith.mulf %22, %24 : vector<8x256xf32>
    %c0_13 = arith.constant 0 : index
    %c0_14 = arith.constant 0 : index
    %26 = vector.load %arg13[%c0_13, %c0_14] : memref<72x256xf32, #tpu.memory_space<vmem>>, vector<8x256xf32>
    tpu.vector_store %arg13[%c0_13, %c0_14], %25 {strides = array<i32>} : memref<72x256xf32, #tpu.memory_space<vmem>>, vector<8x256xf32>,
    %c0_15 = arith.constant 0 : index
    %c18 = arith.constant 18 : index
    %27 = vector.load %arg12[%c0_15, %c18] : memref<16x324xf32, #tpu.memory_space<vmem>>, vector<8x256xf32>
    %c1 = arith.constant 1 : index
    %c0_16 = arith.constant 0 : index
    %28 = vector.load %arg2[%c1, %c0_16] : memref<16x256xf32, #tpu.memory_space<vmem>>, vector<1x256xf32>
    %29 = vector.broadcast %28 : vector<1x256xf32> to vector<8x256xf32>
    %30 = arith.mulf %27, %29 : vector<8x256xf32>
    %c8 = arith.constant 8 : index
    %c0_17 = arith.constant 0 : index
    %31 = vector.load %arg13[%c8, %c0_17] : memref<72x256xf32, #tpu.memory_space<vmem>>, vector<8x256xf32>
    tpu.vector_store %arg13[%c8, %c0_17], %30 {strides = array<i32>} : memref<72x256xf32, #tpu.memory_space<vmem>>, vector<8x256xf32>,
    %c0_18 = arith.constant 0 : index
    %c19 = arith.constant 19 : index
    %32 = vector.load %arg12[%c0_18, %c19] : memref<16x324xf32, #tpu.memory_space<vmem>>, vector<8x256xf32>
    %c2 = arith.constant 2 : index
    %c0_19 = arith.constant 0 : index
    %33 = vector.load %arg2[%c2, %c0_19] : memref<16x256xf32, #tpu.memory_space<vmem>>, vector<1x256xf32>
    %34 = vector.broadcast %33 : vector<1x256xf32> to vector<8x256xf32>
    %35 = arith.mulf %32, %34 : vector<8x256xf32>
    %c16 = arith.constant 16 : index
    %c0_20 = arith.constant 0 : index
    %36 = vector.load %arg13[%c16, %c0_20] : memref<72x256xf32, #tpu.memory_space<vmem>>, vector<8x256xf32>
    tpu.vector_store %arg13[%c16, %c0_20], %35 {strides = array<i32>} : memref<72x256xf32, #tpu.memory_space<vmem>>, vector<8x256xf32>,
    %c0_21 = arith.constant 0 : index
    %c33 = arith.constant 33 : index
    %37 = vector.load %arg12[%c0_21, %c33] : memref<16x324xf32, #tpu.memory_space<vmem>>, vector<8x256xf32>
    %c0_22 = arith.constant 0 : index
    %c0_23 = arith.constant 0 : index
    %38 = vector.load %arg2[%c0_22, %c0_23] : memref<16x256xf32, #tpu.memory_space<vmem>>, vector<1x256xf32>
    %39 = vector.broadcast %38 : vector<1x256xf32> to vector<8x256xf32>
    %40 = arith.mulf %37, %39 : vector<8x256xf32>
    %c24 = arith.constant 24 : index
    %c0_24 = arith.constant 0 : index
    %41 = vector.load %arg13[%c24, %c0_24] : memref<72x256xf32, #tpu.memory_space<vmem>>, vector<8x256xf32>
    tpu.vector_store %arg13[%c24, %c0_24], %40 {strides = array<i32>} : memref<72x256xf32, #tpu.memory_space<vmem>>, vector<8x256xf32>,
    %c0_25 = arith.constant 0 : index
    %c34 = arith.constant 34 : index
    %42 = vector.load %arg12[%c0_25, %c34] : memref<16x324xf32, #tpu.memory_space<vmem>>, vector<8x256xf32>
    %c1_26 = arith.constant 1 : index
    %c0_27 = arith.constant 0 : index
    %43 = vector.load %arg2[%c1_26, %c0_27] : memref<16x256xf32, #tpu.memory_space<vmem>>, vector<1x256xf32>
    %44 = vector.broadcast %43 : vector<1x256xf32> to vector<8x256xf32>
    %45 = arith.mulf %42, %44 : vector<8x256xf32>
    %c32 = arith.constant 32 : index
    %c0_28 = arith.constant 0 : index
    %46 = vector.load %arg13[%c32, %c0_28] : memref<72x256xf32, #tpu.memory_space<vmem>>, vector<8x256xf32>
    tpu.vector_store %arg13[%c32, %c0_28], %45 {strides = array<i32>} : memref<72x256xf32, #tpu.memory_space<vmem>>, vector<8x256xf32>,
    %c0_29 = arith.constant 0 : index
    %c35 = arith.constant 35 : index
    %47 = vector.load %arg12[%c0_29, %c35] : memref<16x324xf32, #tpu.memory_space<vmem>>, vector<8x256xf32>
    %c2_30 = arith.constant 2 : index
    %c0_31 = arith.constant 0 : index
    %48 = vector.load %arg2[%c2_30, %c0_31] : memref<16x256xf32, #tpu.memory_space<vmem>>, vector<1x256xf32>
    %49 = vector.broadcast %48 : vector<1x256xf32> to vector<8x256xf32>
    %50 = arith.mulf %47, %49 : vector<8x256xf32>
    %c40 = arith.constant 40 : index
    %c0_32 = arith.constant 0 : index
    %51 = vector.load %arg13[%c40, %c0_32] : memref<72x256xf32, #tpu.memory_space<vmem>>, vector<8x256xf32>
    tpu.vector_store %arg13[%c40, %c0_32], %50 {strides = array<i32>} : memref<72x256xf32, #tpu.memory_space<vmem>>, vector<8x256xf32>,
    %c0_33 = arith.constant 0 : index
    %c49 = arith.constant 49 : index
    %52 = vector.load %arg12[%c0_33, %c49] : memref<16x324xf32, #tpu.memory_space<vmem>>, vector<8x256xf32>
    %c0_34 = arith.constant 0 : index
    %c0_35 = arith.constant 0 : index
    %53 = vector.load %arg2[%c0_34, %c0_35] : memref<16x256xf32, #tpu.memory_space<vmem>>, vector<1x256xf32>
    %54 = vector.broadcast %53 : vector<1x256xf32> to vector<8x256xf32>
    %55 = arith.mulf %52, %54 : vector<8x256xf32>
    %c48 = arith.constant 48 : index
    %c0_36 = arith.constant 0 : index
    %56 = vector.load %arg13[%c48, %c0_36] : memref<72x256xf32, #tpu.memory_space<vmem>>, vector<8x256xf32>
    tpu.vector_store %arg13[%c48, %c0_36], %55 {strides = array<i32>} : memref<72x256xf32, #tpu.memory_space<vmem>>, vector<8x256xf32>,
    %c0_37 = arith.constant 0 : index
    %c50 = arith.constant 50 : index
    %57 = vector.load %arg12[%c0_37, %c50] : memref<16x324xf32, #tpu.memory_space<vmem>>, vector<8x256xf32>
    %c1_38 = arith.constant 1 : index
    %c0_39 = arith.constant 0 : index
    %58 = vector.load %arg2[%c1_38, %c0_39] : memref<16x256xf32, #tpu.memory_space<vmem>>, vector<1x256xf32>
    %59 = vector.broadcast %58 : vector<1x256xf32> to vector<8x256xf32>
    %60 = arith.mulf %57, %59 : vector<8x256xf32>
    %c56 = arith.constant 56 : index
    %c0_40 = arith.constant 0 : index
    %61 = vector.load %arg13[%c56, %c0_40] : memref<72x256xf32, #tpu.memory_space<vmem>>, vector<8x256xf32>
    tpu.vector_store %arg13[%c56, %c0_40], %60 {strides = array<i32>} : memref<72x256xf32, #tpu.memory_space<vmem>>, vector<8x256xf32>,
    %c0_41 = arith.constant 0 : index
    %c51 = arith.constant 51 : index
    %62 = vector.load %arg12[%c0_41, %c51] : memref<16x324xf32, #tpu.memory_space<vmem>>, vector<8x256xf32>
    %c2_42 = arith.constant 2 : index
    %c0_43 = arith.constant 0 : index
    %63 = vector.load %arg2[%c2_42, %c0_43] : memref<16x256xf32, #tpu.memory_space<vmem>>, vector<1x256xf32>
    %64 = vector.broadcast %63 : vector<1x256xf32> to vector<8x256xf32>
    %65 = arith.mulf %62, %64 : vector<8x256xf32>
    %c64 = arith.constant 64 : index
    %c0_44 = arith.constant 0 : index
    %66 = vector.load %arg13[%c64, %c0_44] : memref<72x256xf32, #tpu.memory_space<vmem>>, vector<8x256xf32>
    tpu.vector_store %arg13[%c64, %c0_44], %65 {strides = array<i32>} : memref<72x256xf32, #tpu.memory_space<vmem>>, vector<8x256xf32>,
    %c0_45 = arith.constant 0 : index
    %c0_46 = arith.constant 0 : index
    %67 = vector.load %arg5[%c0_45, %c0_46] : memref<8x72xf32, #tpu.memory_space<vmem>>, vector<8x72xf32>
    %c0_47 = arith.constant 0 : index
    %c0_48 = arith.constant 0 : index
    %68 = vector.load %arg13[%c0_47, %c0_48] : memref<72x256xf32, #tpu.memory_space<vmem>>, vector<72x256xf32>
    %cst_49 = arith.constant dense<0.000000e+00> : vector<8x256xf32>
    %69 = tpu.matmul %67, %68, %cst_49 {dimension_numbers = #tpu.dot_dimension_numbers<[1], [0], [0], [1], [0, 0, 1, 1], [], []>} : vector<8x72xf32>, vector<72x256xf32>, vector<8x256xf32> -> vector<8x256xf32>
    %c0_50 = arith.constant 0 : index
    %c0_51 = arith.constant 0 : index
    %70 = vector.load %arg6[%c0_50, %c0_51] : memref<8x1xf32, #tpu.memory_space<vmem>>, vector<8x1xf32>
    %71 = vector.broadcast %70 : vector<8x1xf32> to vector<8x256xf32>
    %72 = arith.addf %69, %71 : vector<8x256xf32>
    %cst_52 = arith.constant 0.000000e+00 : f32
    %73 = vector.broadcast %cst_52 : f32 to vector<8x256xf32>
    %74 = arith.maximumf %72, %73 : vector<8x256xf32>
    %c8_53 = arith.constant 8 : index
    %c0_54 = arith.constant 0 : index
    %75 = vector.load %arg12[%c8_53, %c0_54] : memref<16x324xf32, #tpu.memory_space<vmem>>, vector<8x256xf32>
    %c3 = arith.constant 3 : index
    %c0_55 = arith.constant 0 : index
    %76 = vector.load %arg2[%c3, %c0_55] : memref<16x256xf32, #tpu.memory_space<vmem>>, vector<1x256xf32>
    %77 = vector.broadcast %76 : vector<1x256xf32> to vector<8x256xf32>
    %78 = arith.mulf %75, %77 : vector<8x256xf32>
    %c0_56 = arith.constant 0 : index
    %c0_57 = arith.constant 0 : index
    %79 = vector.load %arg14[%c0_56, %c0_57] : memref<200x256xf32, #tpu.memory_space<vmem>>, vector<8x256xf32>
    tpu.vector_store %arg14[%c0_56, %c0_57], %78 {strides = array<i32>} : memref<200x256xf32, #tpu.memory_space<vmem>>, vector<8x256xf32>,
    %c8_58 = arith.constant 8 : index
    %c1_59 = arith.constant 1 : index
    %80 = vector.load %arg12[%c8_58, %c1_59] : memref<16x324xf32, #tpu.memory_space<vmem>>, vector<8x256xf32>
    %c4 = arith.constant 4 : index
    %c0_60 = arith.constant 0 : index
    %81 = vector.load %arg2[%c4, %c0_60] : memref<16x256xf32, #tpu.memory_space<vmem>>, vector<1x256xf32>
    %82 = vector.broadcast %81 : vector<1x256xf32> to vector<8x256xf32>
    %83 = arith.mulf %80, %82 : vector<8x256xf32>
    %c8_61 = arith.constant 8 : index
    %c0_62 = arith.constant 0 : index
    %84 = vector.load %arg14[%c8_61, %c0_62] : memref<200x256xf32, #tpu.memory_space<vmem>>, vector<8x256xf32>
    tpu.vector_store %arg14[%c8_61, %c0_62], %83 {strides = array<i32>} : memref<200x256xf32, #tpu.memory_space<vmem>>, vector<8x256xf32>,
    %c8_63 = arith.constant 8 : index
    %c2_64 = arith.constant 2 : index
    %85 = vector.load %arg12[%c8_63, %c2_64] : memref<16x324xf32, #tpu.memory_space<vmem>>, vector<8x256xf32>
    %c5 = arith.constant 5 : index
    %c0_65 = arith.constant 0 : index
    %86 = vector.load %arg2[%c5, %c0_65] : memref<16x256xf32, #tpu.memory_space<vmem>>, vector<1x256xf32>
    %87 = vector.broadcast %86 : vector<1x256xf32> to vector<8x256xf32>
    %88 = arith.mulf %85, %87 : vector<8x256xf32>
    %c16_66 = arith.constant 16 : index
    %c0_67 = arith.constant 0 : index
    %89 = vector.load %arg14[%c16_66, %c0_67] : memref<200x256xf32, #tpu.memory_space<vmem>>, vector<8x256xf32>
    tpu.vector_store %arg14[%c16_66, %c0_67], %88 {strides = array<i32>} : memref<200x256xf32, #tpu.memory_space<vmem>>, vector<8x256xf32>,
    %c8_68 = arith.constant 8 : index
    %c3_69 = arith.constant 3 : index
    %90 = vector.load %arg12[%c8_68, %c3_69] : memref<16x324xf32, #tpu.memory_space<vmem>>, vector<8x256xf32>
    %c6 = arith.constant 6 : index
    %c0_70 = arith.constant 0 : index
    %91 = vector.load %arg2[%c6, %c0_70] : memref<16x256xf32, #tpu.memory_space<vmem>>, vector<1x256xf32>
    %92 = vector.broadcast %91 : vector<1x256xf32> to vector<8x256xf32>
    %93 = arith.mulf %90, %92 : vector<8x256xf32>
    %c24_71 = arith.constant 24 : index
    %c0_72 = arith.constant 0 : index
    %94 = vector.load %arg14[%c24_71, %c0_72] : memref<200x256xf32, #tpu.memory_space<vmem>>, vector<8x256xf32>
    tpu.vector_store %arg14[%c24_71, %c0_72], %93 {strides = array<i32>} : memref<200x256xf32, #tpu.memory_space<vmem>>, vector<8x256xf32>,
    %c8_73 = arith.constant 8 : index
    %c4_74 = arith.constant 4 : index
    %95 = vector.load %arg12[%c8_73, %c4_74] : memref<16x324xf32, #tpu.memory_space<vmem>>, vector<8x256xf32>
    %c7 = arith.constant 7 : index
    %c0_75 = arith.constant 0 : index
    %96 = vector.load %arg2[%c7, %c0_75] : memref<16x256xf32, #tpu.memory_space<vmem>>, vector<1x256xf32>
    %97 = vector.broadcast %96 : vector<1x256xf32> to vector<8x256xf32>
    %98 = arith.mulf %95, %97 : vector<8x256xf32>
    %c32_76 = arith.constant 32 : index
    %c0_77 = arith.constant 0 : index
    %99 = vector.load %arg14[%c32_76, %c0_77] : memref<200x256xf32, #tpu.memory_space<vmem>>, vector<8x256xf32>
    tpu.vector_store %arg14[%c32_76, %c0_77], %98 {strides = array<i32>} : memref<200x256xf32, #tpu.memory_space<vmem>>, vector<8x256xf32>,
    %c8_78 = arith.constant 8 : index
    %c16_79 = arith.constant 16 : index
    %100 = vector.load %arg12[%c8_78, %c16_79] : memref<16x324xf32, #tpu.memory_space<vmem>>, vector<8x256xf32>
    %c3_80 = arith.constant 3 : index
    %c0_81 = arith.constant 0 : index
    %101 = vector.load %arg2[%c3_80, %c0_81] : memref<16x256xf32, #tpu.memory_space<vmem>>, vector<1x256xf32>
    %102 = vector.broadcast %101 : vector<1x256xf32> to vector<8x256xf32>
    %103 = arith.mulf %100, %102 : vector<8x256xf32>
    %c40_82 = arith.constant 40 : index
    %c0_83 = arith.constant 0 : index
    %104 = vector.load %arg14[%c40_82, %c0_83] : memref<200x256xf32, #tpu.memory_space<vmem>>, vector<8x256xf32>
    tpu.vector_store %arg14[%c40_82, %c0_83], %103 {strides = array<i32>} : memref<200x256xf32, #tpu.memory_space<vmem>>, vector<8x256xf32>,
    %c8_84 = arith.constant 8 : index
    %c17_85 = arith.constant 17 : index
    %105 = vector.load %arg12[%c8_84, %c17_85] : memref<16x324xf32, #tpu.memory_space<vmem>>, vector<8x256xf32>
    %c4_86 = arith.constant 4 : index
    %c0_87 = arith.constant 0 : index
    %106 = vector.load %arg2[%c4_86, %c0_87] : memref<16x256xf32, #tpu.memory_space<vmem>>, vector<1x256xf32>
    %107 = vector.broadcast %106 : vector<1x256xf32> to vector<8x256xf32>
    %108 = arith.mulf %105, %107 : vector<8x256xf32>
    %c48_88 = arith.constant 48 : index
    %c0_89 = arith.constant 0 : index
    %109 = vector.load %arg14[%c48_88, %c0_89] : memref<200x256xf32, #tpu.memory_space<vmem>>, vector<8x256xf32>
    tpu.vector_store %arg14[%c48_88, %c0_89], %108 {strides = array<i32>} : memref<200x256xf32, #tpu.memory_space<vmem>>, vector<8x256xf32>,
    %c8_90 = arith.constant 8 : index
    %c18_91 = arith.constant 18 : index
    %110 = vector.load %arg12[%c8_90, %c18_91] : memref<16x324xf32, #tpu.memory_space<vmem>>, vector<8x256xf32>
    %c5_92 = arith.constant 5 : index
    %c0_93 = arith.constant 0 : index
    %111 = vector.load %arg2[%c5_92, %c0_93] : memref<16x256xf32, #tpu.memory_space<vmem>>, vector<1x256xf32>
    %112 = vector.broadcast %111 : vector<1x256xf32> to vector<8x256xf32>
    %113 = arith.mulf %110, %112 : vector<8x256xf32>
    %c56_94 = arith.constant 56 : index
    %c0_95 = arith.constant 0 : index
    %114 = vector.load %arg14[%c56_94, %c0_95] : memref<200x256xf32, #tpu.memory_space<vmem>>, vector<8x256xf32>
    tpu.vector_store %arg14[%c56_94, %c0_95], %113 {strides = array<i32>} : memref<200x256xf32, #tpu.memory_space<vmem>>, vector<8x256xf32>,
    %c8_96 = arith.constant 8 : index
    %c19_97 = arith.constant 19 : index
    %115 = vector.load %arg12[%c8_96, %c19_97] : memref<16x324xf32, #tpu.memory_space<vmem>>, vector<8x256xf32>
    %c6_98 = arith.constant 6 : index
    %c0_99 = arith.constant 0 : index
    %116 = vector.load %arg2[%c6_98, %c0_99] : memref<16x256xf32, #tpu.memory_space<vmem>>, vector<1x256xf32>
    %117 = vector.broadcast %116 : vector<1x256xf32> to vector<8x256xf32>
    %118 = arith.mulf %115, %117 : vector<8x256xf32>
    %c64_100 = arith.constant 64 : index
    %c0_101 = arith.constant 0 : index
    %119 = vector.load %arg14[%c64_100, %c0_101] : memref<200x256xf32, #tpu.memory_space<vmem>>, vector<8x256xf32>
    tpu.vector_store %arg14[%c64_100, %c0_101], %118 {strides = array<i32>} : memref<200x256xf32, #tpu.memory_space<vmem>>, vector<8x256xf32>,
    %c8_102 = arith.constant 8 : index
    %c20 = arith.constant 20 : index
    %120 = vector.load %arg12[%c8_102, %c20] : memref<16x324xf32, #tpu.memory_space<vmem>>, vector<8x256xf32>
    %c7_103 = arith.constant 7 : index
    %c0_104 = arith.constant 0 : index
    %121 = vector.load %arg2[%c7_103, %c0_104] : memref<16x256xf32, #tpu.memory_space<vmem>>, vector<1x256xf32>
    %122 = vector.broadcast %121 : vector<1x256xf32> to vector<8x256xf32>
    %123 = arith.mulf %120, %122 : vector<8x256xf32>
    %c72 = arith.constant 72 : index
    %c0_105 = arith.constant 0 : index
    %124 = vector.load %arg14[%c72, %c0_105] : memref<200x256xf32, #tpu.memory_space<vmem>>, vector<8x256xf32>
    tpu.vector_store %arg14[%c72, %c0_105], %123 {strides = array<i32>} : memref<200x256xf32, #tpu.memory_space<vmem>>, vector<8x256xf32>,
    %c8_106 = arith.constant 8 : index
    %c32_107 = arith.constant 32 : index
    %125 = vector.load %arg12[%c8_106, %c32_107] : memref<16x324xf32, #tpu.memory_space<vmem>>, vector<8x256xf32>
    %c3_108 = arith.constant 3 : index
    %c0_109 = arith.constant 0 : index
    %126 = vector.load %arg2[%c3_108, %c0_109] : memref<16x256xf32, #tpu.memory_space<vmem>>, vector<1x256xf32>
    %127 = vector.broadcast %126 : vector<1x256xf32> to vector<8x256xf32>
    %128 = arith.mulf %125, %127 : vector<8x256xf32>
    %c80 = arith.constant 80 : index
    %c0_110 = arith.constant 0 : index
    %129 = vector.load %arg14[%c80, %c0_110] : memref<200x256xf32, #tpu.memory_space<vmem>>, vector<8x256xf32>
    tpu.vector_store %arg14[%c80, %c0_110], %128 {strides = array<i32>} : memref<200x256xf32, #tpu.memory_space<vmem>>, vector<8x256xf32>,
    %c8_111 = arith.constant 8 : index
    %c33_112 = arith.constant 33 : index
    %130 = vector.load %arg12[%c8_111, %c33_112] : memref<16x324xf32, #tpu.memory_space<vmem>>, vector<8x256xf32>
    %c4_113 = arith.constant 4 : index
    %c0_114 = arith.constant 0 : index
    %131 = vector.load %arg2[%c4_113, %c0_114] : memref<16x256xf32, #tpu.memory_space<vmem>>, vector<1x256xf32>
    %132 = vector.broadcast %131 : vector<1x256xf32> to vector<8x256xf32>
    %133 = arith.mulf %130, %132 : vector<8x256xf32>
    %c88 = arith.constant 88 : index
    %c0_115 = arith.constant 0 : index
    %134 = vector.load %arg14[%c88, %c0_115] : memref<200x256xf32, #tpu.memory_space<vmem>>, vector<8x256xf32>
    tpu.vector_store %arg14[%c88, %c0_115], %133 {strides = array<i32>} : memref<200x256xf32, #tpu.memory_space<vmem>>, vector<8x256xf32>,
    %c8_116 = arith.constant 8 : index
    %c34_117 = arith.constant 34 : index
    %135 = vector.load %arg12[%c8_116, %c34_117] : memref<16x324xf32, #tpu.memory_space<vmem>>, vector<8x256xf32>
    %c5_118 = arith.constant 5 : index
    %c0_119 = arith.constant 0 : index
    %136 = vector.load %arg2[%c5_118, %c0_119] : memref<16x256xf32, #tpu.memory_space<vmem>>, vector<1x256xf32>
    %137 = vector.broadcast %136 : vector<1x256xf32> to vector<8x256xf32>
    %138 = arith.mulf %135, %137 : vector<8x256xf32>
    %c96 = arith.constant 96 : index
    %c0_120 = arith.constant 0 : index
    %139 = vector.load %arg14[%c96, %c0_120] : memref<200x256xf32, #tpu.memory_space<vmem>>, vector<8x256xf32>
    tpu.vector_store %arg14[%c96, %c0_120], %138 {strides = array<i32>} : memref<200x256xf32, #tpu.memory_space<vmem>>, vector<8x256xf32>,
    %c8_121 = arith.constant 8 : index
    %c35_122 = arith.constant 35 : index
    %140 = vector.load %arg12[%c8_121, %c35_122] : memref<16x324xf32, #tpu.memory_space<vmem>>, vector<8x256xf32>
    %c6_123 = arith.constant 6 : index
    %c0_124 = arith.constant 0 : index
    %141 = vector.load %arg2[%c6_123, %c0_124] : memref<16x256xf32, #tpu.memory_space<vmem>>, vector<1x256xf32>
    %142 = vector.broadcast %141 : vector<1x256xf32> to vector<8x256xf32>
    %143 = arith.mulf %140, %142 : vector<8x256xf32>
    %c104 = arith.constant 104 : index
    %c0_125 = arith.constant 0 : index
    %144 = vector.load %arg14[%c104, %c0_125] : memref<200x256xf32, #tpu.memory_space<vmem>>, vector<8x256xf32>
    tpu.vector_store %arg14[%c104, %c0_125], %143 {strides = array<i32>} : memref<200x256xf32, #tpu.memory_space<vmem>>, vector<8x256xf32>,
    %c8_126 = arith.constant 8 : index
    %c36 = arith.constant 36 : index
    %145 = vector.load %arg12[%c8_126, %c36] : memref<16x324xf32, #tpu.memory_space<vmem>>, vector<8x256xf32>
    %c7_127 = arith.constant 7 : index
    %c0_128 = arith.constant 0 : index
    %146 = vector.load %arg2[%c7_127, %c0_128] : memref<16x256xf32, #tpu.memory_space<vmem>>, vector<1x256xf32>
    %147 = vector.broadcast %146 : vector<1x256xf32> to vector<8x256xf32>
    %148 = arith.mulf %145, %147 : vector<8x256xf32>
    %c112 = arith.constant 112 : index
    %c0_129 = arith.constant 0 : index
    %149 = vector.load %arg14[%c112, %c0_129] : memref<200x256xf32, #tpu.memory_space<vmem>>, vector<8x256xf32>
    tpu.vector_store %arg14[%c112, %c0_129], %148 {strides = array<i32>} : memref<200x256xf32, #tpu.memory_space<vmem>>, vector<8x256xf32>,
    %c8_130 = arith.constant 8 : index
    %c48_131 = arith.constant 48 : index
    %150 = vector.load %arg12[%c8_130, %c48_131] : memref<16x324xf32, #tpu.memory_space<vmem>>, vector<8x256xf32>
    %c3_132 = arith.constant 3 : index
    %c0_133 = arith.constant 0 : index
    %151 = vector.load %arg2[%c3_132, %c0_133] : memref<16x256xf32, #tpu.memory_space<vmem>>, vector<1x256xf32>
    %152 = vector.broadcast %151 : vector<1x256xf32> to vector<8x256xf32>
    %153 = arith.mulf %150, %152 : vector<8x256xf32>
    %c120 = arith.constant 120 : index
    %c0_134 = arith.constant 0 : index
    %154 = vector.load %arg14[%c120, %c0_134] : memref<200x256xf32, #tpu.memory_space<vmem>>, vector<8x256xf32>
    tpu.vector_store %arg14[%c120, %c0_134], %153 {strides = array<i32>} : memref<200x256xf32, #tpu.memory_space<vmem>>, vector<8x256xf32>,
    %c8_135 = arith.constant 8 : index
    %c49_136 = arith.constant 49 : index
    %155 = vector.load %arg12[%c8_135, %c49_136] : memref<16x324xf32, #tpu.memory_space<vmem>>, vector<8x256xf32>
    %c4_137 = arith.constant 4 : index
    %c0_138 = arith.constant 0 : index
    %156 = vector.load %arg2[%c4_137, %c0_138] : memref<16x256xf32, #tpu.memory_space<vmem>>, vector<1x256xf32>
    %157 = vector.broadcast %156 : vector<1x256xf32> to vector<8x256xf32>
    %158 = arith.mulf %155, %157 : vector<8x256xf32>
    %c128 = arith.constant 128 : index
    %c0_139 = arith.constant 0 : index
    %159 = vector.load %arg14[%c128, %c0_139] : memref<200x256xf32, #tpu.memory_space<vmem>>, vector<8x256xf32>
    tpu.vector_store %arg14[%c128, %c0_139], %158 {strides = array<i32>} : memref<200x256xf32, #tpu.memory_space<vmem>>, vector<8x256xf32>,
    %c8_140 = arith.constant 8 : index
    %c50_141 = arith.constant 50 : index
    %160 = vector.load %arg12[%c8_140, %c50_141] : memref<16x324xf32, #tpu.memory_space<vmem>>, vector<8x256xf32>
    %c5_142 = arith.constant 5 : index
    %c0_143 = arith.constant 0 : index
    %161 = vector.load %arg2[%c5_142, %c0_143] : memref<16x256xf32, #tpu.memory_space<vmem>>, vector<1x256xf32>
    %162 = vector.broadcast %161 : vector<1x256xf32> to vector<8x256xf32>
    %163 = arith.mulf %160, %162 : vector<8x256xf32>
    %c136 = arith.constant 136 : index
    %c0_144 = arith.constant 0 : index
    %164 = vector.load %arg14[%c136, %c0_144] : memref<200x256xf32, #tpu.memory_space<vmem>>, vector<8x256xf32>
    tpu.vector_store %arg14[%c136, %c0_144], %163 {strides = array<i32>} : memref<200x256xf32, #tpu.memory_space<vmem>>, vector<8x256xf32>,
    %c8_145 = arith.constant 8 : index
    %c51_146 = arith.constant 51 : index
    %165 = vector.load %arg12[%c8_145, %c51_146] : memref<16x324xf32, #tpu.memory_space<vmem>>, vector<8x256xf32>
    %c6_147 = arith.constant 6 : index
    %c0_148 = arith.constant 0 : index
    %166 = vector.load %arg2[%c6_147, %c0_148] : memref<16x256xf32, #tpu.memory_space<vmem>>, vector<1x256xf32>
    %167 = vector.broadcast %166 : vector<1x256xf32> to vector<8x256xf32>
    %168 = arith.mulf %165, %167 : vector<8x256xf32>
    %c144 = arith.constant 144 : index
    %c0_149 = arith.constant 0 : index
    %169 = vector.load %arg14[%c144, %c0_149] : memref<200x256xf32, #tpu.memory_space<vmem>>, vector<8x256xf32>
    tpu.vector_store %arg14[%c144, %c0_149], %168 {strides = array<i32>} : memref<200x256xf32, #tpu.memory_space<vmem>>, vector<8x256xf32>,
    %c8_150 = arith.constant 8 : index
    %c52 = arith.constant 52 : index
    %170 = vector.load %arg12[%c8_150, %c52] : memref<16x324xf32, #tpu.memory_space<vmem>>, vector<8x256xf32>
    %c7_151 = arith.constant 7 : index
    %c0_152 = arith.constant 0 : index
    %171 = vector.load %arg2[%c7_151, %c0_152] : memref<16x256xf32, #tpu.memory_space<vmem>>, vector<1x256xf32>
    %172 = vector.broadcast %171 : vector<1x256xf32> to vector<8x256xf32>
    %173 = arith.mulf %170, %172 : vector<8x256xf32>
    %c152 = arith.constant 152 : index
    %c0_153 = arith.constant 0 : index
    %174 = vector.load %arg14[%c152, %c0_153] : memref<200x256xf32, #tpu.memory_space<vmem>>, vector<8x256xf32>
    tpu.vector_store %arg14[%c152, %c0_153], %173 {strides = array<i32>} : memref<200x256xf32, #tpu.memory_space<vmem>>, vector<8x256xf32>,
    %c8_154 = arith.constant 8 : index
    %c64_155 = arith.constant 64 : index
    %175 = vector.load %arg12[%c8_154, %c64_155] : memref<16x324xf32, #tpu.memory_space<vmem>>, vector<8x256xf32>
    %c3_156 = arith.constant 3 : index
    %c0_157 = arith.constant 0 : index
    %176 = vector.load %arg2[%c3_156, %c0_157] : memref<16x256xf32, #tpu.memory_space<vmem>>, vector<1x256xf32>
    %177 = vector.broadcast %176 : vector<1x256xf32> to vector<8x256xf32>
    %178 = arith.mulf %175, %177 : vector<8x256xf32>
    %c160 = arith.constant 160 : index
    %c0_158 = arith.constant 0 : index
    %179 = vector.load %arg14[%c160, %c0_158] : memref<200x256xf32, #tpu.memory_space<vmem>>, vector<8x256xf32>
    tpu.vector_store %arg14[%c160, %c0_158], %178 {strides = array<i32>} : memref<200x256xf32, #tpu.memory_space<vmem>>, vector<8x256xf32>,
    %c8_159 = arith.constant 8 : index
    %c65 = arith.constant 65 : index
    %180 = vector.load %arg12[%c8_159, %c65] : memref<16x324xf32, #tpu.memory_space<vmem>>, vector<8x256xf32>
    %c4_160 = arith.constant 4 : index
    %c0_161 = arith.constant 0 : index
    %181 = vector.load %arg2[%c4_160, %c0_161] : memref<16x256xf32, #tpu.memory_space<vmem>>, vector<1x256xf32>
    %182 = vector.broadcast %181 : vector<1x256xf32> to vector<8x256xf32>
    %183 = arith.mulf %180, %182 : vector<8x256xf32>
    %c168 = arith.constant 168 : index
    %c0_162 = arith.constant 0 : index
    %184 = vector.load %arg14[%c168, %c0_162] : memref<200x256xf32, #tpu.memory_space<vmem>>, vector<8x256xf32>
    tpu.vector_store %arg14[%c168, %c0_162], %183 {strides = array<i32>} : memref<200x256xf32, #tpu.memory_space<vmem>>, vector<8x256xf32>,
    %c8_163 = arith.constant 8 : index
    %c66 = arith.constant 66 : index
    %185 = vector.load %arg12[%c8_163, %c66] : memref<16x324xf32, #tpu.memory_space<vmem>>, vector<8x256xf32>
    %c5_164 = arith.constant 5 : index
    %c0_165 = arith.constant 0 : index
    %186 = vector.load %arg2[%c5_164, %c0_165] : memref<16x256xf32, #tpu.memory_space<vmem>>, vector<1x256xf32>
    %187 = vector.broadcast %186 : vector<1x256xf32> to vector<8x256xf32>
    %188 = arith.mulf %185, %187 : vector<8x256xf32>
    %c176 = arith.constant 176 : index
    %c0_166 = arith.constant 0 : index
    %189 = vector.load %arg14[%c176, %c0_166] : memref<200x256xf32, #tpu.memory_space<vmem>>, vector<8x256xf32>
    tpu.vector_store %arg14[%c176, %c0_166], %188 {strides = array<i32>} : memref<200x256xf32, #tpu.memory_space<vmem>>, vector<8x256xf32>,
    %c8_167 = arith.constant 8 : index
    %c67 = arith.constant 67 : index
    %190 = vector.load %arg12[%c8_167, %c67] : memref<16x324xf32, #tpu.memory_space<vmem>>, vector<8x256xf32>
    %c6_168 = arith.constant 6 : index
    %c0_169 = arith.constant 0 : index
    %191 = vector.load %arg2[%c6_168, %c0_169] : memref<16x256xf32, #tpu.memory_space<vmem>>, vector<1x256xf32>
    %192 = vector.broadcast %191 : vector<1x256xf32> to vector<8x256xf32>
    %193 = arith.mulf %190, %192 : vector<8x256xf32>
    %c184 = arith.constant 184 : index
    %c0_170 = arith.constant 0 : index
    %194 = vector.load %arg14[%c184, %c0_170] : memref<200x256xf32, #tpu.memory_space<vmem>>, vector<8x256xf32>
    tpu.vector_store %arg14[%c184, %c0_170], %193 {strides = array<i32>} : memref<200x256xf32, #tpu.memory_space<vmem>>, vector<8x256xf32>,
    %c8_171 = arith.constant 8 : index
    %c68 = arith.constant 68 : index
    %195 = vector.load %arg12[%c8_171, %c68] : memref<16x324xf32, #tpu.memory_space<vmem>>, vector<8x256xf32>
    %c7_172 = arith.constant 7 : index
    %c0_173 = arith.constant 0 : index
    %196 = vector.load %arg2[%c7_172, %c0_173] : memref<16x256xf32, #tpu.memory_space<vmem>>, vector<1x256xf32>
    %197 = vector.broadcast %196 : vector<1x256xf32> to vector<8x256xf32>
    %198 = arith.mulf %195, %197 : vector<8x256xf32>
    %c192 = arith.constant 192 : index
    %c0_174 = arith.constant 0 : index
    %199 = vector.load %arg14[%c192, %c0_174] : memref<200x256xf32, #tpu.memory_space<vmem>>, vector<8x256xf32>
    tpu.vector_store %arg14[%c192, %c0_174], %198 {strides = array<i32>} : memref<200x256xf32, #tpu.memory_space<vmem>>, vector<8x256xf32>,
    %c0_175 = arith.constant 0 : index
    %c0_176 = arith.constant 0 : index
    %200 = vector.load %arg7[%c0_175, %c0_176] : memref<8x200xf32, #tpu.memory_space<vmem>>, vector<8x200xf32>
    %c0_177 = arith.constant 0 : index
    %c0_178 = arith.constant 0 : index
    %201 = vector.load %arg14[%c0_177, %c0_178] : memref<200x256xf32, #tpu.memory_space<vmem>>, vector<200x256xf32>
    %cst_179 = arith.constant dense<0.000000e+00> : vector<8x256xf32>
    %202 = tpu.matmul %200, %201, %cst_179 {dimension_numbers = #tpu.dot_dimension_numbers<[1], [0], [0], [1], [0, 0, 1, 1], [], []>} : vector<8x200xf32>, vector<200x256xf32>, vector<8x256xf32> -> vector<8x256xf32>
    %c0_180 = arith.constant 0 : index
    %c0_181 = arith.constant 0 : index
    %203 = vector.load %arg8[%c0_180, %c0_181] : memref<8x1xf32, #tpu.memory_space<vmem>>, vector<8x1xf32>
    %204 = vector.broadcast %203 : vector<8x1xf32> to vector<8x256xf32>
    %205 = arith.addf %202, %204 : vector<8x256xf32>
    %cst_182 = arith.constant 0.000000e+00 : f32
    %206 = vector.broadcast %cst_182 : f32 to vector<8x256xf32>
    %207 = arith.maximumf %205, %206 : vector<8x256xf32>
    %c0_183 = arith.constant 0 : index
    %c0_184 = arith.constant 0 : index
    %c34_185 = arith.constant 34 : index
    %208 = vector.load %arg1[%c0_183, %c0_184, %c34_185] : memref<1x4x324xf32, #tpu.memory_space<vmem>>, vector<1x4x256xf32>
    %209 = vector.shape_cast %208 : vector<1x4x256xf32> to vector<4x256xf32>
    %c0_186 = arith.constant 0 : index
    %c0_187 = arith.constant 0 : index
    %c17_188 = arith.constant 17 : index
    %210 = vector.load %arg1[%c0_186, %c0_187, %c17_188] : memref<1x4x324xf32, #tpu.memory_space<vmem>>, vector<1x4x256xf32>
    %211 = vector.shape_cast %210 : vector<1x4x256xf32> to vector<4x256xf32>
    %c8_189 = arith.constant 8 : index
    %c0_190 = arith.constant 0 : index
    %212 = vector.load %arg2[%c8_189, %c0_190] : memref<16x256xf32, #tpu.memory_space<vmem>>, vector<1x256xf32>
    %213 = vector.broadcast %212 : vector<1x256xf32> to vector<4x256xf32>
    %214 = arith.addf %211, %213 : vector<4x256xf32>
    %215 = arith.maximumf %209, %214 : vector<4x256xf32>
    %c0_191 = arith.constant 0 : index
    %c0_192 = arith.constant 0 : index
    %c18_193 = arith.constant 18 : index
    %216 = vector.load %arg1[%c0_191, %c0_192, %c18_193] : memref<1x4x324xf32, #tpu.memory_space<vmem>>, vector<1x4x256xf32>
    %217 = vector.shape_cast %216 : vector<1x4x256xf32> to vector<4x256xf32>
    %c9 = arith.constant 9 : index
    %c0_194 = arith.constant 0 : index
    %218 = vector.load %arg2[%c9, %c0_194] : memref<16x256xf32, #tpu.memory_space<vmem>>, vector<1x256xf32>
    %219 = vector.broadcast %218 : vector<1x256xf32> to vector<4x256xf32>
    %220 = arith.addf %217, %219 : vector<4x256xf32>
    %221 = arith.maximumf %215, %220 : vector<4x256xf32>
    %c0_195 = arith.constant 0 : index
    %c0_196 = arith.constant 0 : index
    %c19_197 = arith.constant 19 : index
    %222 = vector.load %arg1[%c0_195, %c0_196, %c19_197] : memref<1x4x324xf32, #tpu.memory_space<vmem>>, vector<1x4x256xf32>
    %223 = vector.shape_cast %222 : vector<1x4x256xf32> to vector<4x256xf32>
    %c10 = arith.constant 10 : index
    %c0_198 = arith.constant 0 : index
    %224 = vector.load %arg2[%c10, %c0_198] : memref<16x256xf32, #tpu.memory_space<vmem>>, vector<1x256xf32>
    %225 = vector.broadcast %224 : vector<1x256xf32> to vector<4x256xf32>
    %226 = arith.addf %223, %225 : vector<4x256xf32>
    %227 = arith.maximumf %221, %226 : vector<4x256xf32>
    %c0_199 = arith.constant 0 : index
    %c0_200 = arith.constant 0 : index
    %c33_201 = arith.constant 33 : index
    %228 = vector.load %arg1[%c0_199, %c0_200, %c33_201] : memref<1x4x324xf32, #tpu.memory_space<vmem>>, vector<1x4x256xf32>
    %229 = vector.shape_cast %228 : vector<1x4x256xf32> to vector<4x256xf32>
    %c11 = arith.constant 11 : index
    %c0_202 = arith.constant 0 : index
    %230 = vector.load %arg2[%c11, %c0_202] : memref<16x256xf32, #tpu.memory_space<vmem>>, vector<1x256xf32>
    %231 = vector.broadcast %230 : vector<1x256xf32> to vector<4x256xf32>
    %232 = arith.addf %229, %231 : vector<4x256xf32>
    %233 = arith.maximumf %227, %232 : vector<4x256xf32>
    %c0_203 = arith.constant 0 : index
    %c0_204 = arith.constant 0 : index
    %c35_205 = arith.constant 35 : index
    %234 = vector.load %arg1[%c0_203, %c0_204, %c35_205] : memref<1x4x324xf32, #tpu.memory_space<vmem>>, vector<1x4x256xf32>
    %235 = vector.shape_cast %234 : vector<1x4x256xf32> to vector<4x256xf32>
    %c12 = arith.constant 12 : index
    %c0_206 = arith.constant 0 : index
    %236 = vector.load %arg2[%c12, %c0_206] : memref<16x256xf32, #tpu.memory_space<vmem>>, vector<1x256xf32>
    %237 = vector.broadcast %236 : vector<1x256xf32> to vector<4x256xf32>
    %238 = arith.addf %235, %237 : vector<4x256xf32>
    %239 = arith.maximumf %233, %238 : vector<4x256xf32>
    %c0_207 = arith.constant 0 : index
    %c0_208 = arith.constant 0 : index
    %c49_209 = arith.constant 49 : index
    %240 = vector.load %arg1[%c0_207, %c0_208, %c49_209] : memref<1x4x324xf32, #tpu.memory_space<vmem>>, vector<1x4x256xf32>
    %241 = vector.shape_cast %240 : vector<1x4x256xf32> to vector<4x256xf32>
    %c13 = arith.constant 13 : index
    %c0_210 = arith.constant 0 : index
    %242 = vector.load %arg2[%c13, %c0_210] : memref<16x256xf32, #tpu.memory_space<vmem>>, vector<1x256xf32>
    %243 = vector.broadcast %242 : vector<1x256xf32> to vector<4x256xf32>
    %244 = arith.addf %241, %243 : vector<4x256xf32>
    %245 = arith.maximumf %239, %244 : vector<4x256xf32>
    %c0_211 = arith.constant 0 : index
    %c0_212 = arith.constant 0 : index
    %c50_213 = arith.constant 50 : index
    %246 = vector.load %arg1[%c0_211, %c0_212, %c50_213] : memref<1x4x324xf32, #tpu.memory_space<vmem>>, vector<1x4x256xf32>
    %247 = vector.shape_cast %246 : vector<1x4x256xf32> to vector<4x256xf32>
    %c14 = arith.constant 14 : index
    %c0_214 = arith.constant 0 : index
    %248 = vector.load %arg2[%c14, %c0_214] : memref<16x256xf32, #tpu.memory_space<vmem>>, vector<1x256xf32>
    %249 = vector.broadcast %248 : vector<1x256xf32> to vector<4x256xf32>
    %250 = arith.addf %247, %249 : vector<4x256xf32>
    %251 = arith.maximumf %245, %250 : vector<4x256xf32>
    %c0_215 = arith.constant 0 : index
    %c0_216 = arith.constant 0 : index
    %c51_217 = arith.constant 51 : index
    %252 = vector.load %arg1[%c0_215, %c0_216, %c51_217] : memref<1x4x324xf32, #tpu.memory_space<vmem>>, vector<1x4x256xf32>
    %253 = vector.shape_cast %252 : vector<1x4x256xf32> to vector<4x256xf32>
    %c15 = arith.constant 15 : index
    %c0_218 = arith.constant 0 : index
    %254 = vector.load %arg2[%c15, %c0_218] : memref<16x256xf32, #tpu.memory_space<vmem>>, vector<1x256xf32>
    %255 = vector.broadcast %254 : vector<1x256xf32> to vector<4x256xf32>
    %256 = arith.addf %253, %255 : vector<4x256xf32>
    %257 = arith.maximumf %251, %256 : vector<4x256xf32>
    %c0_219 = arith.constant 0 : index
    %c0_220 = arith.constant 0 : index
    %258 = vector.load %arg9[%c0_219, %c0_220] : memref<4x4xf32, #tpu.memory_space<vmem>>, vector<4x4xf32>
    %cst_221 = arith.constant dense<0.000000e+00> : vector<4x256xf32>
    %259 = tpu.matmul %258, %257, %cst_221 {dimension_numbers = #tpu.dot_dimension_numbers<[1], [0], [0], [1], [0, 0, 1, 1], [], []>} : vector<4x4xf32>, vector<4x256xf32>, vector<4x256xf32> -> vector<4x256xf32>
    %c0_222 = arith.constant 0 : index
    %c0_223 = arith.constant 0 : index
    %260 = vector.load %arg10[%c0_222, %c0_223] : memref<4x1xf32, #tpu.memory_space<vmem>>, vector<4x1xf32>
    %261 = vector.broadcast %260 : vector<4x1xf32> to vector<4x256xf32>
    %262 = arith.addf %259, %261 : vector<4x256xf32>
    %cst_224 = arith.constant 0.000000e+00 : f32
    %263 = vector.broadcast %cst_224 : f32 to vector<4x256xf32>
    %264 = arith.maximumf %262, %263 : vector<4x256xf32>
    %c0_225 = arith.constant 0 : index
    %c0_226 = arith.constant 0 : index
    %c0_227 = arith.constant 0 : index
    %265 = vector.load %arg11[%c0_225, %c0_226, %c0_227] : memref<1x24x256xf32, #tpu.memory_space<vmem>>, vector<1x4x256xf32>
    %266 = vector.shape_cast %265 : vector<1x4x256xf32> to vector<4x256xf32>
    %267 = vector.shape_cast %21 : vector<4x256xf32> to vector<1x4x256xf32>
    tpu.vector_store %arg11[%c0_225, %c0_226, %c0_227], %267 {strides = array<i32>} : memref<1x24x256xf32, #tpu.memory_space<vmem>>, vector<1x4x256xf32>,
    %c0_228 = arith.constant 0 : index
    %c4_229 = arith.constant 4 : index
    %c0_230 = arith.constant 0 : index
    %268 = vector.load %arg11[%c0_228, %c4_229, %c0_230] : memref<1x24x256xf32, #tpu.memory_space<vmem>>, vector<1x8x256xf32>
    %269 = vector.shape_cast %268 : vector<1x8x256xf32> to vector<8x256xf32>
    %270 = vector.shape_cast %74 : vector<8x256xf32> to vector<1x8x256xf32>
    tpu.vector_store %arg11[%c0_228, %c4_229, %c0_230], %270 {strides = array<i32>} : memref<1x24x256xf32, #tpu.memory_space<vmem>>, vector<1x8x256xf32>,
    %c0_231 = arith.constant 0 : index
    %c12_232 = arith.constant 12 : index
    %c0_233 = arith.constant 0 : index
    %271 = vector.load %arg11[%c0_231, %c12_232, %c0_233] : memref<1x24x256xf32, #tpu.memory_space<vmem>>, vector<1x8x256xf32>
    %272 = vector.shape_cast %271 : vector<1x8x256xf32> to vector<8x256xf32>
    %273 = vector.shape_cast %207 : vector<8x256xf32> to vector<1x8x256xf32>
    tpu.vector_store %arg11[%c0_231, %c12_232, %c0_233], %273 {strides = array<i32>} : memref<1x24x256xf32, #tpu.memory_space<vmem>>, vector<1x8x256xf32>,
    %c0_234 = arith.constant 0 : index
    %c20_235 = arith.constant 20 : index
    %c0_236 = arith.constant 0 : index
    %274 = vector.load %arg11[%c0_234, %c20_235, %c0_236] : memref<1x24x256xf32, #tpu.memory_space<vmem>>, vector<1x4x256xf32>
    %275 = vector.shape_cast %274 : vector<1x4x256xf32> to vector<4x256xf32>
    %276 = vector.shape_cast %264 : vector<4x256xf32> to vector<1x4x256xf32>
    tpu.vector_store %arg11[%c0_234, %c20_235, %c0_236], %276 {strides = array<i32>} : memref<1x24x256xf32, #tpu.memory_space<vmem>>, vector<1x4x256xf32>,
    return
  }
  func.func @transform_0(%arg0: i32) -> (i32, i32, i32) {
    %c0_i32 = arith.constant 0 : i32
    %c0_i32_0 = arith.constant 0 : i32
    %c0_i32_1 = arith.constant 0 : i32
    return %arg0, %c0_i32, %c0_i32_0 : i32, i32, i32
  }
  func.func @transform_1(%arg0: i32) -> (i32, i32) {
    %c0_i32 = arith.constant 0 : i32
    %c0_i32_0 = arith.constant 0 : i32
    %c0_i32_1 = arith.constant 0 : i32
    return %c0_i32, %c0_i32_0 : i32, i32
  }
  func.func @transform_2(%arg0: i32) -> (i32, i32) {
    %c0_i32 = arith.constant 0 : i32
    %c0_i32_0 = arith.constant 0 : i32
    %c0_i32_1 = arith.constant 0 : i32
    return %c0_i32, %c0_i32_0 : i32, i32
  }
  func.func @transform_3(%arg0: i32) -> (i32, i32) {
    %c0_i32 = arith.constant 0 : i32
    %c0_i32_0 = arith.constant 0 : i32
    %c0_i32_1 = arith.constant 0 : i32
    return %c0_i32, %c0_i32_0 : i32, i32
  }
  func.func @transform_4(%arg0: i32) -> (i32, i32) {
    %c0_i32 = arith.constant 0 : i32
    %c0_i32_0 = arith.constant 0 : i32
    %c0_i32_1 = arith.constant 0 : i32
    return %c0_i32, %c0_i32_0 : i32, i32
  }
  func.func @transform_5(%arg0: i32) -> (i32, i32) {
    %c0_i32 = arith.constant 0 : i32
    %c0_i32_0 = arith.constant 0 : i32
    %c0_i32_1 = arith.constant 0 : i32
    return %c0_i32, %c0_i32_0 : i32, i32
  }
  func.func @transform_6(%arg0: i32) -> (i32, i32) {
    %c0_i32 = arith.constant 0 : i32
    %c0_i32_0 = arith.constant 0 : i32
    %c0_i32_1 = arith.constant 0 : i32
    return %c0_i32, %c0_i32_0 : i32, i32
  }
  func.func @transform_7(%arg0: i32) -> (i32, i32) {
    %c0_i32 = arith.constant 0 : i32
    %c0_i32_0 = arith.constant 0 : i32
    %c0_i32_1 = arith.constant 0 : i32
    return %c0_i32, %c0_i32_0 : i32, i32
  }
  func.func @transform_8(%arg0: i32) -> (i32, i32) {
    %c0_i32 = arith.constant 0 : i32
    %c0_i32_0 = arith.constant 0 : i32
    %c0_i32_1 = arith.constant 0 : i32
    return %c0_i32, %c0_i32_0 : i32, i32
  }
  func.func @transform_9(%arg0: i32) -> (i32, i32) {
    %c0_i32 = arith.constant 0 : i32
    %c0_i32_0 = arith.constant 0 : i32
    %c0_i32_1 = arith.constant 0 : i32
    return %c0_i32, %c0_i32_0 : i32, i32
  }
  func.func @transform_10(%arg0: i32) -> (i32, i32, i32) {
    %c0_i32 = arith.constant 0 : i32
    %c0_i32_0 = arith.constant 0 : i32
    %c0_i32_1 = arith.constant 0 : i32
    return %arg0, %c0_i32, %c0_i32_0 : i32, i32, i32
  }
}

</mosaic_0001>

<bundles_post_ra>
// kernel: inception_forward.1
= control target key start
LH: loop header
LB: loop body
LE: loop exit
PB: predicated region body
PF: predicated region fallthrough
CT: control target
= control target key end

     0   :  { %s2927_s13 = smov 0   ;;  %s4039_s0 = inlined_call_operand.vmem [shape: f32[2,4,324], index: 0, kind: input, shape index: {}]   ;;  %s4040_s1 = inlined_call_operand.vmem [shape: f32[16,256], index: 1, kind: input, shape index: {}]   ;;  %s4041_s2 = inlined_call_operand.vmem [shape: f32[20,4], index: 2, kind: input, shape index: {}]   ;;  %s4042_s3 = inlined_call_operand.vmem [shape: f32[20,1], index: 3, kind: input, shape index: {}]   ;;  %s4043_s4 = inlined_call_operand.vmem [shape: f32[8,72], index: 4, kind: input, shape index: {}]   ;;  %s4044_s5 = inlined_call_operand.vmem [shape: f32[8,1], index: 5, kind: input, shape index: {}]   ;;  %s4045_s6 = inlined_call_operand.vmem [shape: f32[8,200], index: 6, kind: input, shape index: {}]   ;;  %s4046_s7 = inlined_call_operand.vmem [shape: f32[8,1], index: 7, kind: input, shape index: {}]   ;;  %s4047_s8 = inlined_call_operand.vmem [shape: f32[4,4], index: 8, kind: input, shape index: {}]   ;;  %s4048_s9 = inlined_call_operand.vmem [shape: f32[4,1], index: 9, kind: input, shape index: {}]   ;;  %s4049_s10 = inlined_call_operand.vmem [shape: f32[2,24,256], index: 10, kind: output, shape index: {}]  }
   0x1 LB: > { %s2668_s14 = sadd.s32 4294967295, %s2818_s13   ;;  %p2672_p0 = scmp.ge.s32.totalorder %s2818_s13, 1  ;;  %s2818_s13 = sphi %s2927_s13, %s20_s13  }
   0x2   : > { %p312_p1 = scmp.lt.s32.totalorder %s2818_s13, 3 }
   0x4   : > { %p313_p2 = pnand %p2672_p0, %p312_p1 }
   0x6   : > { %316 = sbr.rel (%p313_p2) target bundleno = 742 (0x2e6), region = 60 }
   0xb   : > { %v367_v0 = vld [vmem:[%s4042_s3 + $0x10] sm:$0xf]  ;;  %v365_v1 = vld [vmem:[%s4042_s3] sm:$0xff]  ;;  %p350_p3 = scmp.lt.s32.totalorder %s2668_s14, 1  ;;  %v575_v2 = vlaneseq  ;;  %v2820_v3 = vmov 0   ;;  %v366_v4 = vld [vmem:[%s4042_s3 + $0x8] sm:$0xff] }
   0xc   : > { %2808 = vset.pattern.permute.xlu1 %v2820_v3  ;;  %2807 = vset.pattern.permute.xlu0 %v2820_v3  ;;  %v4050_v6 = vmov 0.0   ;;  %v2717_v7 = vld [vmem:[%s4040_s1 + $0x10] ss:$8 sm:$0x3]  ;;  %vm396_vm0 = vcmask 1043456   ;;  %v360_v24 = vld [vmem:[%s4041_s2] sm:$0xff] }
   0xd   : > { %380 = vperm.xlu1 %2808, %v367_v0   ;;  %370 = vperm.xlu0 %2807, %v365_v1   ;;  %s4076_s14 = smov (!%p350_p3, %s2668_s14), 1  ;;  %v613_v5 = vshrl.u32 %v575_v2, 7  ;;  %v2719_v8 = vld [vmem:[%s4040_s1 + $0x12] ss:$8 sm:$0x3]  ;;  %vm4054_vm1 = vcmask 31744  }
   0xe   : > { %467 = vmatprep.mubr.f32.mxu0 %v4050_v6  ;;  %s2745_s25 = smul.u32 12, %s4076_s14  ;;  %v2718_v11 = vld [vmem:[%s4040_s1 + $0x11] ss:$8 sm:$0x3]  ;;  %s2822_s21 = smov 17   ;;  %v361_v37 = vld [vmem:[%s4041_s2 + $0x8] sm:$0xff] }
   0xf   : > { %v2955_v9 = vsub.s32 0, %v613_v5  ;;  %v2957_v10 = vsub.s32 1, %v613_v5  ;;  %v2721_v16 = vld [vmem:[%s4040_s1 + $0x14] ss:$8 sm:$0x3]  ;;  %s2823_s22 = smov 18  }
  0x10   : > { %s2965_s30 = scalar_lea.vmem %s4039_s0, %s2745_s25  ;;  %v2720_v20 = vld [vmem:[%s4040_s1 + $0x13] ss:$8 sm:$0x3]  ;;  %v2722_v27 = vld [vmem:[%s4040_s1 + $0x15] ss:$8 sm:$0x3] }
  0x11   : > { %4055 = vst [vmem:[#allocation5_spill] sm:$0xff] %v2955_v9  ;;  %4056 = vst [vmem:[#allocation6_spill] sm:$0xff] %v2957_v10  ;;  %375 = vperm.xlu0 %2807, %v366_v4   ;;  %v2208_v12 = vrot.slane %v2717_v7, %v2955_v9  ;;  %v2212_v13 = vrot.slane %v2717_v7, %v2957_v10  ;;  %v2274_v14 = vrot.slane %v2719_v8, %v2955_v9  ;;  %v2975_v17 = vld [vmem:[%s2965_s30] sm:$0xff]  ;;  %v364_v31 = vld [vmem:[%s2965_s30 + $0x8] sm:$0xf]  ;;  %s2824_s29 = smov 19  }
  0x12   : > { %v2278_v15 = vrot.slane %v2719_v8, %v2957_v10  ;;  %v2241_v18 = vrot.slane %v2718_v11, %v2955_v9  ;;  %v2245_v19 = vrot.slane %v2718_v11, %v2957_v10  ;;  %v385_v21 = vcombine.high %v2975_v17, %v2975_v17  ;;  %v2723_v33 = vld [vmem:[%s4040_s1 + $0x16] ss:$8 sm:$0x3]  ;;  %v2724_v36 = vld [vmem:[%s4040_s1 + $0x17] ss:$8 sm:$0x3] }
  0x13   : > { %v2213_v22 = vcombine.low %v2208_v12, %v2212_v13  ;;  %v2308_v23 = vrot.slane %v2720_v20, %v2955_v9  ;;  %v2312_v26 = vrot.slane %v2720_v20, %v2957_v10  ;;  %v2341_v29 = vrot.slane %v2721_v16, %v2955_v9  ;;  %s2825_s11 = smov 33   ;;  %v362_v44 = vld [vmem:[%s4041_s2 + $0x10] sm:$0xf]  ;;  %s2826_s16 = smov 35  }
  0x14   : > { %v2246_v25 = vcombine.low %v2241_v18, %v2245_v19  ;;  %2675 = vmatprep.subr.msk.mxu0 %vm396_vm0, %v385_v21  ;;  %v2279_v28 = vcombine.low %v2274_v14, %v2278_v15  ;;  %v2345_v30 = vrot.slane %v2721_v16, %v2957_v10  ;;  %v2375_v34 = vrot.slane %v2722_v27, %v2955_v9  ;;  %s2827_s17 = smov 49   ;;  %v610_v46 = vld [vmem:[%s4040_s1] ss:$8 sm:$0x3]  ;;  %s2829_s20 = smov 50  }
  0x15   : > { %2214 = vrot.lane.b32.xlu1 %v2213_v22, %s2822_s21  ;;  %2676 = vmatpush1.msk.msra.mxu0 %vm396_vm0, %v2975_v17  ;;  %v2313_v32 = vcombine.low %v2308_v23, %v2312_v26  ;;  %v2379_v35 = vrot.slane %v2722_v27, %v2957_v10  ;;  %v2410_v39 = vrot.slane %v2723_v33, %v2955_v9  ;;  %vm2828_vm2 = vmmov 0   ;;  %s2830_s23 = smov 51   ;;  %v2684_v49 = vld [vmem:[%s4040_s1 + $0x1] ss:$8 sm:$0x3]  ;;  %s2831_s15 = smov 48  }
  0x16   : > { %2247 = vrot.lane.b32.xlu0 %v2246_v25, %s2823_s22  ;;  %2677 = vmatmul.mubr.msk.f32.vlgmr.msra.gmra.mxu0 %vm4054_vm1, %v360_v24  ;;  %v2346_v38 = vcombine.low %v2341_v29, %v2345_v30  ;;  %v2414_v40 = vrot.slane %v2723_v33, %v2957_v10  ;;  %v2444_v42 = vrot.slane %v2724_v36, %v2955_v9  ;;  %v2706_v52 = vld [vmem:[%s4040_s1 + $0x3] ss:$8 sm:$0x3]  ;;  %v2705_v55 = vld [vmem:[%s4040_s1 + $0x7] ss:$8 sm:$0x3] }
  0x17   : > { %2734 = vmatprep.subr.mxu0 %v4050_v6  ;;  %473 = vmatprep.mubr.f32.mxu0 %v4050_v6  ;;  %v2380_v41 = vcombine.low %v2375_v34, %v2379_v35  ;;  %v2448_v43 = vrot.slane %v2724_v36, %v2957_v10  ;;  %v615_v48 = vrot.slane %v610_v46, %v2955_v9  ;;  %v2704_v58 = vld [vmem:[%s4040_s1 + $0x6] ss:$8 sm:$0x3]  ;;  %s2832_s24 = smov 36   ;;  %s2833_s12 = smov 34   ;;  %vm624_vm3 = vcmask 138240  }
  0x18   : > { %2735 = vmatpush3.msk.msra.mxu0 %vm396_vm0, %v364_v31  ;;  %v2415_v45 = vcombine.low %v2410_v39, %v2414_v40  ;;  %v619_v50 = vrot.slane %v610_v46, %v2957_v10  ;;  %v661_v51 = vrot.slane %v2684_v49, %v2957_v10  ;;  %v657_v53 = vrot.slane %v2684_v49, %v2955_v9  ;;  %v2703_v61 = vld [vmem:[%s4040_s1 + $0x5] ss:$8 sm:$0x3]  ;;  %v2702_v0 = vld [vmem:[%s4040_s1 + $0x4] ss:$8 sm:$0x3] }
  0x19   : > { %2280 = vrot.lane.b32.xlu1 %v2279_v28, %s2824_s29  ;;  %v2449_v47 = vcombine.low %v2444_v42, %v2448_v43  ;;  %v1672_v54 = vrot.slane %v2706_v52, %v2955_v9  ;;  %v1676_v56 = vrot.slane %v2706_v52, %v2957_v10  ;;  %v1631_v57 = vrot.slane %v2705_v55, %v2955_v9  ;;  %v2701_v4 = vld [vmem:[%s4040_s1 + $0x3] ss:$8 sm:$0x3]  ;;  %v2700_v8 = vld [vmem:[%s4040_s1 + $0x7] ss:$8 sm:$0x3] }
  0x1a   : > { %2314 = vrot.lane.b32.xlu0 %v2313_v32, %s2825_s11  ;;  %2678 = vmatmul.mubr.msk.f32.gmra.mxu0 %vm4054_vm1, %v361_v37  ;;  %v1635_v59 = vrot.slane %v2705_v55, %v2957_v10  ;;  %v1592_v60 = vrot.slane %v2704_v58, %v2955_v9  ;;  %v1596_v62 = vrot.slane %v2704_v58, %v2957_v10  ;;  %s2834_s25 = smov 32   ;;  %v2699_v13 = vld [vmem:[%s4040_s1 + $0x6] ss:$8 sm:$0x3]  ;;  %s2835_s28 = smov 20   ;;  %vm708_vm4 = vcmask 154624  }
  0x1b   : > { %479 = vmatprep.mubr.f32.mxu0 %v4050_v6  ;;  %v1553_v63 = vrot.slane %v2703_v61, %v2955_v9  ;;  %v1557_v1 = vrot.slane %v2703_v61, %v2957_v10  ;;  %v1514_v3 = vrot.slane %v2702_v0, %v2955_v9  ;;  %v1518_v5 = vrot.slane %v2702_v0, %v2957_v10  ;;  %v2698_v16 = vld [vmem:[%s4040_s1 + $0x5] ss:$8 sm:$0x3]  ;;  %v2697_v20 = vld [vmem:[%s4040_s1 + $0x4] ss:$8 sm:$0x3] }
  0x1c   : > { %v1473_v7 = vrot.slane %v2701_v4, %v2955_v9  ;;  %v1477_v11 = vrot.slane %v2701_v4, %v2957_v10  ;;  %v1432_v12 = vrot.slane %v2700_v8, %v2955_v9  ;;  %v1436_v14 = vrot.slane %v2700_v8, %v2957_v10  ;;  %v2696_v23 = vld [vmem:[%s4040_s1 + $0x3] ss:$8 sm:$0x3]  ;;  %v2695_v26 = vld [vmem:[%s4040_s1 + $0x7] ss:$8 sm:$0x3] }
  0x1d   : > { %2347 = vrot.lane.b32.xlu1 %v2346_v38, %s2826_s16  ;;  %v1393_v15 = vrot.slane %v2699_v13, %v2955_v9  ;;  %v1397_v18 = vrot.slane %v2699_v13, %v2957_v10  ;;  %v1354_v19 = vrot.slane %v2698_v16, %v2955_v9  ;;  %v1358_v21 = vrot.slane %v2698_v16, %v2957_v10  ;;  %v2694_v29 = vld [vmem:[%s4040_s1 + $0x6] ss:$8 sm:$0x3]  ;;  %s2837_s19 = smov 4   ;;  %s2838_s26 = smov 3  }
  0x1e   : > { %2381 = vrot.lane.b32.xlu0 %v2380_v41, %s2827_s17  ;;  %2679 = vmatmul.mubr.msk.f32.gmra.mxu0 %vm4054_vm1, %v362_v44  ;;  %v1315_v22 = vrot.slane %v2697_v20, %v2955_v9  ;;  %v1274_v25 = vrot.slane %v2696_v23, %v2955_v9  ;;  %v1278_v27 = vrot.slane %v2696_v23, %v2957_v10  ;;  %v2693_v32 = vld [vmem:[%s4040_s1 + $0x5] ss:$8 sm:$0x3]  ;;  %v2689_v35 = vld [vmem:[%s4040_s1 + $0x2] ss:$8 sm:$0x3] }
  0x1f   : > { %2736 = vmatprep.mubr.msk.f32.mxu0 %vm2828_vm2, %v4050_v6  ;;  %v1234_v28 = vrot.slane %v2695_v26, %v2955_v9  ;;  %v1238_v30 = vrot.slane %v2695_v26, %v2957_v10  ;;  %v1192_v31 = vrot.slane %v2694_v29, %v2955_v9  ;;  %v1196_v33 = vrot.slane %v2694_v29, %v2957_v10  ;;  %v2692_v38 = vld [vmem:[%s4040_s1 + $0x4] ss:$8 sm:$0x3]  ;;  %v2688_v41 = vld [vmem:[%s4040_s1 + $0x1] ss:$8 sm:$0x3] }
  0x20   : > { %v1150_v34 = vrot.slane %v2693_v32, %v2955_v9  ;;  %v1154_v36 = vrot.slane %v2693_v32, %v2957_v10  ;;  %v949_v39 = vrot.slane %v2689_v35, %v2957_v10  ;;  %v1108_v40 = vrot.slane %v2692_v38, %v2955_v9  ;;  %v735_v32 = vld [vmem:[%s4040_s1] ss:$8 sm:$0x3]  ;;  %s2846_s18 = smov 65   ;;  %s2857_s27 = smov 95  }
  0x21   : > { %2416 = vrot.lane.b32.xlu1 %v2415_v45, %s2829_s20  ;;  %v1112_v42 = vrot.slane %v2692_v38, %v2957_v10  ;;  %v904_v43 = vrot.slane %v2688_v41, %v2955_v9  ;;  %v908_v45 = vrot.slane %v2688_v41, %v2957_v10  ;;  %vm666_vm5 = vcmask 146432  }
  0x22   : > { %2450 = vrot.lane.b32.xlu0 %v2449_v47, %s2830_s23  ;;  %2737 = vmatmul.mubr.msk.f32.vlgmr.msra.gmra.mxu0 %vm4054_vm1, %v360_v24  ;;  %v1319_v24 = vrot.slane %v2697_v20, %v2957_v10  ;;  %v2715_v47 = vld [vmem:[%s4040_s1 + $0x7] ss:$8 sm:$0x3]  ;;  %vm831_vm6 = vcmask 285696   ;;  %vm749_vm7 = vcmask 269312   ;;  %v744_v41 = vrot.slane %v735_v32, %v2957_v10 }
  0x23   : > { %2739 = vmatprep.mubr.msk.f32.mxu0 %vm2828_vm2, %v4050_v6  ;;  %v2038_v49 = vrot.slane %v2715_v47, %v2957_v10  ;;  %vm872_vm8 = vcmask 400384   ;;  %vm913_vm9 = vcmask 408576   ;;  %vm954_vm10 = vcmask 416768  }
  0x24   : > { %vm602_vm13 = vcmask 556032   ;;  %vm1681_vm14 = vcmask 392192   ;;  %vm1640_vm15 = vcmask 293888  }
  0x25   : > { %620 = vrot.lane.b32.xlu1 %v615_v48, %s2822_s21 }
  0x26   : > { %622 = vrot.lane.b32.xlu0 %v619_v50, %s2822_s21  ;;  %2740 = vmatmul.mubr.msk.f32.gmra.mxu0 %vm4054_vm1, %v361_v37  ;;  %v945_v37 = vrot.slane %v2689_v35, %v2955_v9  ;;  %v2687_v50 = vld [vmem:[%s4040_s1 + $0x2] ss:$8 sm:$0x3]  ;;  %v740_v35 = vrot.slane %v735_v32, %v2955_v9 }
  0x27   : > { %2742 = vmatprep.mubr.msk.f32.mxu0 %vm2828_vm2, %v4050_v6  ;;  %v822_v52 = vrot.slane %v2687_v50, %v2955_v9  ;;  %vm790_vm2 = vcmask 277504  }
  0x29   : > { %664 = vrot.lane.b32.xlu1 %v661_v51, %s2823_s22  ;;  %v2034_v51 = vrot.slane %v2715_v47, %v2955_v9 }
  0x2a   : > { %662 = vrot.lane.b32.xlu0 %v657_v53, %s2823_s22  ;;  %2743 = vmatmul.mubr.msk.f32.gmra.mxu0 %vm4054_vm1, %v362_v44  ;;  %v858_v44 = vld [vmem:[%s4040_s1] ss:$8 sm:$0x3]  ;;  %v2714_v53 = vld [vmem:[%s4040_s1 + $0x6] ss:$8 sm:$0x3] }
  0x2b   : > { %1071 = vmatprep.mubr.f32.mxu0 %v4050_v6  ;;  %v867_v46 = vrot.slane %v858_v44, %v2957_v10  ;;  %v863_v48 = vrot.slane %v858_v44, %v2955_v9  ;;  %v1993_v55 = vrot.slane %v2714_v53, %v2955_v9 }
  0x2d   : > { %1677 = vrot.lane.b32.xlu1 %v1672_v54, %s2831_s15  ;;  %v826_v54 = vrot.slane %v2687_v50, %v2957_v10  ;;  %v2685_v50 = vld [vmem:[%s4040_s1 + $0x2] ss:$8 sm:$0x3] }
  0x2e   : > { %1679 = vrot.lane.b32.xlu0 %v1676_v56, %s2831_s15  ;;  %s2836_s15 = smov 16   ;;  %v2686_v56 = vld [vmem:[%s4040_s1 + $0x1] ss:$8 sm:$0x3] }
  0x2f   : > { %v781_v58 = vrot.slane %v2686_v56, %v2955_v9 }
  0x31   : > { %1636 = vrot.lane.b32.xlu1 %v1631_v57, %s2832_s24  ;;  %v1997_v57 = vrot.slane %v2714_v53, %v2957_v10 }
  0x32   : > { %1638 = vrot.lane.b32.xlu0 %v1635_v59, %s2832_s24  ;;  %v2713_v59 = vld [vmem:[%s4040_s1 + $0x5] ss:$8 sm:$0x3]  ;;  %s2864_s24 = smov 77  }
  0x33   : > { %v1952_v61 = vrot.slane %v2713_v59, %v2955_v9 }
  0x35   : > { %1597 = vrot.lane.b32.xlu1 %v1592_v60, %s2826_s16  ;;  %v785_v60 = vrot.slane %v2686_v56, %v2957_v10  ;;  %v699_v56 = vrot.slane %v2685_v50, %v2955_v9 }
  0x36   : > { %1599 = vrot.lane.b32.xlu0 %v1596_v62, %s2826_s16  ;;  %v1956_v62 = vrot.slane %v2713_v59, %v2957_v10 }
  0x39   : > { %1558 = vrot.lane.b32.xlu1 %v1553_v63, %s2833_s12 }
  0x3a   : > { %1560 = vrot.lane.b32.xlu0 %v1557_v1, %s2833_s12  ;;  %v3201_v1 = vld [vmem:[%s2965_s30 + $0x8] sm:$0xf] }
  0x3d   : > { %1519 = vrot.lane.b32.xlu1 %v1514_v3, %s2825_s11 }
  0x3e   : > { %1521 = vrot.lane.b32.xlu0 %v1518_v5, %s2825_s11 }
  0x41   : > { %1478 = vrot.lane.b32.xlu1 %v1473_v7, %s2834_s25 }
  0x42   : > { %1480 = vrot.lane.b32.xlu0 %v1477_v11, %s2834_s25  ;;  %s2841_s25 = smov 68  }
  0x45   : > { %1437 = vrot.lane.b32.xlu1 %v1432_v12, %s2835_s28 }
  0x46   : > { %1439 = vrot.lane.b32.xlu0 %v1436_v14, %s2835_s28  ;;  %s2845_s28 = smov 127  }
  0x49   : > { %1398 = vrot.lane.b32.xlu1 %v1393_v15, %s2824_s29 }
  0x4a   : > { %1400 = vrot.lane.b32.xlu0 %v1397_v18, %s2824_s29 }
  0x4d   : > { %1359 = vrot.lane.b32.xlu1 %v1354_v19, %s2823_s22 }
  0x4e   : > { %1361 = vrot.lane.b32.xlu0 %v1358_v21, %s2823_s22  ;;  %s2839_s22 = smov 2  }
  0x51   : > { %1320 = vrot.lane.b32.xlu1 %v1315_v22, %s2822_s21 }
  0x52   : > { %1322 = vrot.lane.b32.xlu0 %v1319_v24, %s2822_s21 }
  0x55   : > { %1279 = vrot.lane.b32.xlu1 %v1274_v25, %s2836_s15 }
  0x56   : > { %1281 = vrot.lane.b32.xlu0 %v1278_v27, %s2836_s15 }
  0x59   : > { %1239 = vrot.lane.b32.xlu1 %v1234_v28, %s2837_s19 }
  0x5a   : > { %1241 = vrot.lane.b32.xlu0 %v1238_v30, %s2837_s19  ;;  %s2842_s19 = smov 67  }
  0x5d   : > { %1197 = vrot.lane.b32.xlu1 %v1192_v31, %s2838_s26 }
  0x5e   : > { %1199 = vrot.lane.b32.xlu0 %v1196_v33, %s2838_s26  ;;  %s2840_s26 = smov 1  }
  0x61   : > { %1155 = vrot.lane.b32.xlu1 %v1150_v34, %s2839_s22 }
  0x62   : > { %1157 = vrot.lane.b32.xlu0 %v1154_v36, %s2839_s22  ;;  %s2859_s22 = smov 108  }
  0x65   : > { %950 = vrot.lane.b32.xlu1 %v945_v37, %s2830_s23  ;;  %v2712_v37 = vld [vmem:[%s4040_s1 + $0x4] ss:$8 sm:$0x3] }
  0x66   : > { %952 = vrot.lane.b32.xlu0 %v949_v39, %s2830_s23 }
  0x69   : > { %1113 = vrot.lane.b32.xlu1 %v1108_v40, %s2840_s26  ;;  %v1911_v40 = vrot.slane %v2712_v37, %v2955_v9 }
  0x6a   : > { %1115 = vrot.lane.b32.xlu0 %v1112_v42, %s2840_s26 }
  0x6d   : > { %909 = vrot.lane.b32.xlu1 %v904_v43, %s2829_s20 }
  0x6e   : > { %911 = vrot.lane.b32.xlu0 %v908_v45, %s2829_s20  ;;  %v1915_v45 = vrot.slane %v2712_v37, %v2957_v10 }
  0x71   : > { %870 = vrot.lane.b32.xlu1 %v867_v46, %s2827_s17 }
  0x72   : > { %868 = vrot.lane.b32.xlu0 %v863_v48, %s2827_s17 }
  0x75   : > { %2041 = vrot.lane.b32.xlu1 %v2038_v49, %s2841_s25 }
  0x76   : > { %2039 = vrot.lane.b32.xlu0 %v2034_v51, %s2841_s25  ;;  %s2867_s25 = smov 60  }
  0x79   : > { %827 = vrot.lane.b32.xlu1 %v822_v52, %s2826_s16 }
  0x7a   : > { %829 = vrot.lane.b32.xlu0 %v826_v54, %s2826_s16  ;;  %s2843_s16 = smov 66  }
  0x7d   : > { %1998 = vrot.lane.b32.xlu1 %v1993_v55, %s2842_s19  ;;  %v703_v55 = vrot.slane %v2685_v50, %v2957_v10 }
  0x7e   : > { %2000 = vrot.lane.b32.xlu0 %v1997_v57, %s2842_s19  ;;  %v2711_v57 = vld [vmem:[%s4040_s1 + $0x3] ss:$8 sm:$0x3]  ;;  %s2863_s19 = smov 126  }
  0x81   : > { %786 = vrot.lane.b32.xlu1 %v781_v58, %s2833_s12 }
  0x82   : > { %788 = vrot.lane.b32.xlu0 %v785_v60, %s2833_s12  ;;  %s2844_s12 = smov 15  }
  0x85   : > { %1957 = vrot.lane.b32.xlu1 %v1952_v61, %s2843_s16  ;;  %v1875_v61 = vrot.slane %v2711_v57, %v2957_v10 }
  0x86   : > { %1959 = vrot.lane.b32.xlu0 %v1956_v62, %s2843_s16  ;;  %v1871_v62 = vrot.slane %v2711_v57, %v2955_v9  ;;  %s2855_s16 = smov 93  }
  0x88   : > { %v3196_v63 = vpop.permute.xlu1 %380  ;;  %v3198_v0 = vpop.permute.xlu0 %370 }
  0x8c   : > { %v2215_v3 = vpop.permute.xlu1 %2214  ;;  %v3203_v4 = vpop.permute.xlu0 %375 }
  0x8d   : > { %v2216_v5 = vrot.slane %v2215_v3, 4 }
  0x8f   : > { %v2221_v7 = vadd.f32 %v2216_v5, %v3201_v1  ;;  %v2217_v14 = vsel %vm624_vm3, %v2216_v5, %v2215_v3 }
  0x90   : > { %v2281_v8 = vpop.permute.xlu1 %2280  ;;  %v2248_v11 = vpop.permute.xlu0 %2247  ;;  %v2220_v24 = vadd.f32 %v2217_v14, %v2975_v17 }
  0x91   : > { %v2282_v12 = vrot.slane %v2281_v8, 4  ;;  %v2249_v13 = vrot.slane %v2248_v11, 4  ;;  %2226 = vrot.lane.b32.xlu1 %v2221_v7, %s2822_s21 }
  0x93   : > { %v2283_v15 = vsel %vm708_vm4, %v2282_v12, %v2281_v8  ;;  %v2250_v16 = vsel %vm666_vm5, %v2249_v13, %v2248_v11  ;;  %v2254_v18 = vadd.f32 %v2249_v13, %v3201_v1  ;;  %v2287_v46 = vadd.f32 %v2282_v12, %v3201_v1  ;;  %v2710_v8 = vld [vmem:[%s4040_s1 + $0x7] ss:$8 sm:$0x3] }
  0x94   : > { %v2348_v19 = vpop.permute.xlu1 %2347  ;;  %v3211_v20 = vpop.permute.xlu0 %2314  ;;  %v2253_v21 = vadd.f32 %v2250_v16, %v2975_v17  ;;  %v2286_v25 = vadd.f32 %v2283_v15, %v2975_v17  ;;  %v1830_v16 = vrot.slane %v2710_v8, %v2955_v9 }
  0x95   : > { %v2349_v22 = vrot.slane %v2348_v19, 4  ;;  %v2316_v23 = vrot.slane %v3211_v20, 4  ;;  %2259 = vrot.lane.b32.xlu1 %v2254_v18, %s2836_s15 }
  0x96   : > { %2257 = vrot.lane.b32.xlu0 %v2253_v21, %s2836_s15  ;;  %s2856_s15 = smov 94  }
  0x97   : > { %v2350_v26 = vsel %vm831_vm6, %v2349_v22, %v2348_v19  ;;  %v2317_v27 = vsel %vm749_vm7, %v2316_v23, %v3211_v20  ;;  %v2354_v36 = vadd.f32 %v2349_v22, %v3201_v1  ;;  %v2321_v15 = vadd.f32 %v2316_v23, %v3201_v1  ;;  %v2709_v23 = vld [vmem:[%s4040_s1 + $0x6] ss:$8 sm:$0x3] }
  0x98   : > { %v3224_v28 = vpop.permute.xlu1 %2416  ;;  %v2382_v29 = vpop.permute.xlu0 %2381  ;;  %v2353_v30 = vadd.f32 %v2350_v26, %v2975_v17  ;;  %v2320_v31 = vadd.f32 %v2317_v27, %v2975_v17  ;;  %v1834_v20 = vrot.slane %v2710_v8, %v2957_v10  ;;  %v1791_v27 = vrot.slane %v2709_v23, %v2955_v9 }
  0x99   : > { %2224 = vrot.lane.b32.xlu1 %v2220_v24, %s2822_s21  ;;  %v2383_v44 = vrot.slane %v2382_v29, 4  ;;  %v2418_v58 = vrot.slane %v3224_v28, 4  ;;  %s2850_s21 = smov 52   ;;  %v1795_v32 = vrot.slane %v2709_v23, %v2957_v10 }
  0x9a   : > { %2290 = vrot.lane.b32.xlu0 %v2286_v25, %s2844_s12 }
  0x9b   : > { %v2384_v49 = vsel %vm872_vm8, %v2383_v44, %v2382_v29  ;;  %v2388_v51 = vadd.f32 %v2383_v44, %v3201_v1  ;;  %v2419_v3 = vsel %vm913_vm9, %v2418_v58, %v3224_v28  ;;  %v2423_v22 = vadd.f32 %v2418_v58, %v3201_v1  ;;  %v2708_v28 = vld [vmem:[%s4040_s1 + $0x5] ss:$8 sm:$0x3] }
  0x9c   : > { %v3232_v33 = vpop.permute.xlu1 %620  ;;  %v3234_v34 = vpop.permute.xlu0 %2450  ;;  %v2387_v54 = vadd.f32 %v2384_v49, %v2975_v17  ;;  %v2422_v11 = vadd.f32 %v2419_v3, %v2975_v17  ;;  %v1756_v37 = vrot.slane %v2708_v28, %v2957_v10 }
  0x9d   : > { %2357 = vrot.lane.b32.xlu1 %v2353_v30, %s2845_s28  ;;  %v2452_v12 = vrot.slane %v3234_v34, 4 }
  0x9e   : > { %2324 = vrot.lane.b32.xlu0 %v2320_v31, %s2840_s26  ;;  %v1752_v31 = vrot.slane %v2708_v28, %v2955_v9 }
  0x9f   : > { %v2453_v18 = vsel %vm954_vm10, %v2452_v12, %v3234_v34  ;;  %v2707_v34 = vld [vmem:[%s4040_s1 + $0x4] ss:$8 sm:$0x3] }
  0xa0   : > { %v3243_v38 = vpop.permute.xlu1 %664  ;;  %v3245_v39 = vpop.permute.xlu0 %622  ;;  %v2456_v24 = vadd.f32 %v2453_v18, %v2975_v17  ;;  %v2457_v17 = vadd.f32 %v2452_v12, %v3201_v1  ;;  %v1713_v1 = vrot.slane %v2707_v34, %v2955_v9  ;;  %v1717_v44 = vrot.slane %v2707_v34, %v2957_v10 }
  0xa1   : > { %745 = vrot.lane.b32.xlu1 %v740_v35, %s2825_s11 }
  0xa2   : > { %2359 = vrot.lane.b32.xlu0 %v2354_v36, %s2845_s28 }
  0xa4   : > { %v3251_v42 = vpop.permute.xlu1 %1677  ;;  %v3253_v43 = vpop.permute.xlu0 %662 }
  0xa5   : > { %1916 = vrot.lane.b32.xlu1 %v1911_v40, %s2846_s18 }
  0xa6   : > { %747 = vrot.lane.b32.xlu0 %v744_v41, %s2825_s11  ;;  %s2847_s11 = smov 113  }
  0xa8   : > { %v3258_v47 = vpop.permute.xlu1 %1636  ;;  %v3260_v48 = vpop.permute.xlu0 %1679 }
  0xa9   : > { %2292 = vrot.lane.b32.xlu1 %v2287_v46, %s2844_s12  ;;  %s2848_s12 = smov 64  }
  0xaa   : > { %1918 = vrot.lane.b32.xlu0 %v1915_v45, %s2846_s18  ;;  %s2860_s18 = smov 109  }
  0xac   : > { %v3267_v52 = vpop.permute.xlu1 %1597  ;;  %v3269_v53 = vpop.permute.xlu0 %1638 }
  0xad   : > { %2393 = vrot.lane.b32.xlu1 %v2388_v51, %s2847_s11  ;;  %v576_v51 = vand.u32 127, %v575_v2 }
  0xae   : > { %2391 = vrot.lane.b32.xlu0 %v2387_v54, %s2847_s11  ;;  %s2865_s11 = smov 78  }
  0xaf   : > { %vm579_vm11 = vcmp.ge.s32.totalorder %v576_v51, 34 }
  0xb0   : > { %v3278_v59 = vpop.permute.xlu1 %1558  ;;  %v3280_v60 = vpop.permute.xlu0 %1599 }
  0xb1   : > { %706 = vrot.lane.b32.xlu1 %v703_v55, %s2824_s29 }
  0xb2   : > { %704 = vrot.lane.b32.xlu0 %v699_v56, %s2824_s29  ;;  %s2849_s29 = smov 112  }
  0xb4   : > { %v3288_v5 = vpop.permute.xlu1 %1519  ;;  %v3290_v7 = vpop.permute.xlu0 %1560 }
  0xb5   : > { %1878 = vrot.lane.b32.xlu1 %v1875_v61, %s2848_s12 }
  0xb6   : > { %1876 = vrot.lane.b32.xlu0 %v1871_v62, %s2848_s12 }
  0xb8   : > { %v3299_v13 = vpop.permute.xlu1 %1478  ;;  %v3301_v14 = vpop.permute.xlu0 %1521 }
  0xb9   : > { %2426 = vrot.lane.b32.xlu1 %v2422_v11, %s2849_s29 }
  0xba   : > { %2326 = vrot.lane.b32.xlu0 %v2321_v15, %s2840_s26  ;;  %s2851_s26 = smov 111  }
  0xbc   : > { %v3311_v19 = vpop.permute.xlu1 %1437  ;;  %v3313_v21 = vpop.permute.xlu0 %1480 }
  0xbd   : > { %1835 = vrot.lane.b32.xlu1 %v1830_v16, %s2850_s21 }
  0xbe   : > { %2428 = vrot.lane.b32.xlu0 %v2423_v22, %s2849_s29 }
  0xc0   : > { %v3322_v25 = vpop.permute.xlu1 %1398  ;;  %v3324_v26 = vpop.permute.xlu0 %1439 }
  0xc1   : > { %2460 = vrot.lane.b32.xlu1 %v2456_v24, %s2851_s26 }
  0xc2   : > { %1837 = vrot.lane.b32.xlu0 %v1834_v20, %s2850_s21  ;;  %s2858_s21 = smov 96  }
  0xc4   : > { %v3331_v29 = vpop.permute.xlu1 %1359  ;;  %v3333_v30 = vpop.permute.xlu0 %1400 }
  0xc5   : > { %1796 = vrot.lane.b32.xlu1 %v1791_v27, %s2830_s23  ;;  %v625_v27 = vsel %vm624_vm3, %v3232_v33, %v3245_v39 }
  0xc6   : > { %2462 = vrot.lane.b32.xlu0 %v2457_v17, %s2851_s26 }
  0xc8   : > { %v3343_v35 = vpop.permute.xlu1 %1320  ;;  %v3345_v36 = vpop.permute.xlu0 %1361 }
  0xc9   : > { %1757 = vrot.lane.b32.xlu1 %v1752_v31, %s2829_s20 }
  0xca   : > { %1798 = vrot.lane.b32.xlu0 %v1795_v32, %s2830_s23  ;;  %s2854_s23 = smov 92  }
  0xcc   : > { %v3351_v40 = vpop.permute.xlu1 %1279  ;;  %v3353_v41 = vpop.permute.xlu0 %1322 }
  0xcd   : > { %1718 = vrot.lane.b32.xlu1 %v1713_v1, %s2827_s17  ;;  %v578_v1 = vadd.s32 256, %v576_v51 }
  0xce   : > { %1759 = vrot.lane.b32.xlu0 %v1756_v37, %s2829_s20  ;;  %s2853_s20 = smov 80  }
  0xcf   : > { %vm584_vm12 = vcmp.lt.s32.totalorder %v578_v1, 290  ;;  %v1682_v1 = vsel %vm1681_vm14, %v3251_v42, %v3260_v48  ;;  %vm1283_vm14 = vcmask 130048  }
  0xd0   : > { %v3358_v45 = vpop.permute.xlu1 %1239  ;;  %v3360_v46 = vpop.permute.xlu0 %1281 }
  0xd2   : > { %1720 = vrot.lane.b32.xlu0 %v1717_v44, %s2827_s17  ;;  %s2852_s17 = smov 110  }
  0xd4   : > { %v3363_v49 = vpop.permute.xlu1 %1197  ;;  %v3365_v50 = vpop.permute.xlu0 %1241 }
  0xd6   : > { %v469_v54 = vpop.f32.mrf.mxu0 }
  0xd7   : > { %v470_v55 = vadd.f32 %v469_v54, %v3198_v0 }
  0xd8   : > { %v3369_v56 = vpop.permute.xlu1 %1155  ;;  %v3371_v57 = vpop.permute.xlu0 %1199 }
  0xd9   : > { %v471_v58 = vpop.f32.mrf.mxu0  ;;  %v566_v61 = vmax.f32 %v470_v55, 0.0 }
  0xda   : > { %v472_v62 = vadd.f32 %v471_v58, %v3198_v0 }
  0xdb   : > { %v475_v3 = vpop.f32.mrf.mxu0  ;;  %v3375_v8 = vsel %vm579_vm11, %v566_v61, 0.0 }
  0xdc   : > { %v3377_v11 = vmax.f32 %v472_v62, 0.0  ;;  %v476_v2 = vadd.f32 %v475_v3, %v3203_v4  ;;  %v3380_v12 = vpop.permute.xlu1 %950  ;;  %v3382_v15 = vpop.permute.xlu0 %1157  ;;  %v671_v18 = vmul.f32 %v3253_v43, %v3375_v8  ;;  %v629_v22 = vmul.f32 %v3232_v33, %v3375_v8 }
  0xdd   : > { %v477_v16 = vpop.f32.mrf.mxu0 }
  0xde   : > { %601 = vst [vmem:[#allocation2 + $0x8] sm:$0xff] %v3377_v11  ;;  %v569_v20 = vmax.f32 %v476_v2, 0.0  ;;  %v478_v23 = vadd.f32 %v477_v16, %v3203_v4  ;;  %677 = vrot.lane.b32.xlu0 %v671_v18, %s2852_s17  ;;  %635 = vrot.lane.b32.xlu1 %v629_v22, %s2851_s26  ;;  %v630_v37 = vmul.f32 %v625_v27, %v3377_v11 }
  0xdf   : > { %v3390_v24 = vpop.f32.mrf.mxu0 }
  0xe0   : > { %4057 = vst [vmem:[#allocation7_spill] sm:$0xff] %v3390_v24  ;;  %v3398_v28 = vsel %vm579_vm11, %v569_v20, 0.0  ;;  %v3400_v17 = vmax.f32 %v478_v23, 0.0  ;;  %v3402_v31 = vpop.permute.xlu1 %1113  ;;  %v3404_v32 = vpop.permute.xlu0 %952  ;;  %vm1482_vm11 = vcmask 261120  }
  0xe1   : > { %604 = vst [vmem:[#allocation2 + $0x18] sm:$0xff] %v3398_v28  ;;  %v3407_v34 = vpop.f32.mrf.mxu0  ;;  %v1686_v44 = vmul.f32 %v3251_v42, %v3398_v28  ;;  %v1645_v61 = vmul.f32 %v3258_v47, %v3398_v28  ;;  %v1605_v62 = vmul.f32 %v3267_v52, %v3398_v28  ;;  %v1566_v23 = vmul.f32 %v3278_v59, %v3398_v28 }
  0xe2   : > { %4058 = vst [vmem:[#allocation8_spill] sm:$0xff] %v3407_v34  ;;  %605 = vst [vmem:[#allocation2 + $0x20] sm:$0xff] %v3400_v17  ;;  %637 = vrot.lane.b32.xlu0 %v630_v37, %s2851_s26  ;;  %v1527_v27 = vmul.f32 %v3288_v5, %v3398_v28  ;;  %v1601_v42 = vsel %vm831_vm6, %v3267_v52, %v3280_v60  ;;  %v1523_v52 = vsel %vm749_vm7, %v3288_v5, %v3301_v14 }
  0xe3   : > { %v552_v33 = vpop.f32.mrf.mxu0  ;;  %1692 = vrot.lane.b32.xlu1 %v1686_v44, %s2853_s20  ;;  %v1402_v5 = vsel %vm708_vm4, %v3322_v25, %v3333_v30  ;;  %v1164_v9 = vmul.f32 %v3369_v56, %v3398_v28 }
  0xe4   : > { %v553_v54 = vadd.f32 %v552_v33, %v3198_v0  ;;  %v3416_v55 = vpop.permute.xlu1 %909  ;;  %v3418_v58 = vpop.permute.xlu0 %1115 }
  0xe5   : > { %v2738_v51 = vpop.f32.mrf.mxu0 }
  0xe6   : > { %v568_v3 = vmax.f32 %v553_v54, 0.0  ;;  %1651 = vrot.lane.b32.xlu0 %v1645_v61, %s2854_s23  ;;  %v1487_v51 = vmul.f32 %v3299_v13, %v3398_v28  ;;  %v1446_v61 = vmul.f32 %v3311_v19, %v3398_v28 }
  0xe7   : > { %v557_v2 = vpop.f32.mrf.mxu0  ;;  %1611 = vrot.lane.b32.xlu1 %v1605_v62, %s2855_s16 }
  0xe8   : > { %v596_v0 = vsel %vm584_vm12, %v568_v3, 0.0  ;;  %v558_v16 = vadd.f32 %v557_v2, %v3203_v4  ;;  %v3428_v18 = vpop.permute.xlu1 %870  ;;  %v3430_v22 = vpop.permute.xlu0 %911  ;;  %v1641_v3 = vsel %vm1640_vm15, %v3258_v47, %v3269_v53  ;;  %v1562_v47 = vsel %vm790_vm2, %v3278_v59, %v3290_v7 }
  0xe9   : > { %603 = vst.msk [vmem:[#allocation2 + $0x10] sm:$0xff] %vm602_vm13, %v596_v0  ;;  %v2741_v20 = vpop.f32.mrf.mxu0  ;;  %v1483_v59 = vsel %vm1482_vm11, %v3299_v13, %v3313_v21  ;;  %v1407_v13 = vmul.f32 %v1402_v5, %v3400_v17  ;;  %vm1201_vm15 = vcmask 23552   ;;  %vm1159_vm11 = vcmask 15360  }
  0xea   : > { %v571_v37 = vmax.f32 %v558_v16, 0.0  ;;  %1572 = vrot.lane.b32.xlu0 %v1566_v23, %s2856_s15  ;;  %v1646_v16 = vmul.f32 %v1641_v3, %v3400_v17  ;;  %v1687_v20 = vmul.f32 %v1682_v1, %v3400_v17  ;;  %v1528_v1 = vmul.f32 %v1523_v52, %v3400_v17 }
  0xeb   : > { %v3437_v44 = vpop.f32.mrf.mxu0  ;;  %1533 = vrot.lane.b32.xlu1 %v1527_v27, %s2857_s27  ;;  %v1160_v6 = vsel %vm1159_vm11, %v3369_v56, %v3382_v15  ;;  %vm1657_vm11 = vcmask 752640  }
  0xec   : > { %4059 = vst [vmem:[#allocation9_spill] sm:$0xff] %v3437_v44  ;;  %v599_v4 = vsel %vm584_vm12, %v571_v37, 0.0  ;;  %v3442_v33 = vpop.permute.xlu1 %2041  ;;  %v3444_v54 = vpop.permute.xlu0 %868  ;;  %v1567_v37 = vmul.f32 %v1562_v47, %v3400_v17  ;;  %vm1441_vm12 = vcmask 162816  }
  0xed   : > { %606 = vst.msk [vmem:[#allocation2 + $0x28] sm:$0xff] %vm602_vm13, %v599_v4  ;;  %v2744_v62 = vpop.f32.mrf.mxu0  ;;  %v1606_v4 = vmul.f32 %v1601_v42, %v3400_v17  ;;  %v1442_v3 = vsel %vm1441_vm12, %v3311_v19, %v3324_v26  ;;  %vm1117_vm12 = vcmask 7168  }
  0xee   : > { %1493 = vrot.lane.b32.xlu0 %v1487_v51, %s2858_s21  ;;  %v1488_v62 = vmul.f32 %v1483_v59, %v3400_v17 }
  0xef   : > { %1452 = vrot.lane.b32.xlu1 %v1446_v61, %s2859_s22 }
  0xf0   : > { %v3457_v2 = vpop.permute.xlu1 %827  ;;  %v3459_v0 = vpop.permute.xlu0 %2039 }
  0xf2   : > { %1653 = vrot.lane.b32.xlu0 %v1646_v16, %s2854_s23  ;;  %v1447_v16 = vmul.f32 %v1442_v3, %v3400_v17 }
  0xf3   : > { %1694 = vrot.lane.b32.xlu1 %v1687_v20, %s2853_s20  ;;  %v3499_v20 = vld [vmem:[#allocation2 + $0x10] sm:$0xff] }
  0xf4   : > { %v3471_v23 = vpop.permute.xlu1 %1998  ;;  %v3473_v27 = vpop.permute.xlu0 %829  ;;  %v3501_v42 = vld [vmem:[#allocation2 + $0x28] sm:$0xff] }
  0xf5   : > { %v1688_v19 = vmul.f32 %v3501_v42, %v3260_v48  ;;  %v1529_v48 = vmul.f32 %v3501_v42, %v3301_v14  ;;  %v1568_v5 = vmul.f32 %v3501_v42, %v3290_v7  ;;  %v1406_v14 = vmul.f32 %v3322_v25, %v3398_v28 }
  0xf6   : > { %1574 = vrot.lane.b32.xlu0 %v1567_v37, %s2856_s15 }
  0xf7   : > { %1613 = vrot.lane.b32.xlu1 %v1606_v4, %s2855_s16  ;;  %v631_v4 = vmul.f32 %v3499_v20, %v3245_v39 }
  0xf8   : > { %v3484_v51 = vpop.permute.xlu0 %2000  ;;  %v3486_v61 = vpop.permute.xlu1 %786 }
  0xfa   : > { %1495 = vrot.lane.b32.xlu0 %v1488_v62, %s2858_s21  ;;  %v1607_v62 = vmul.f32 %v3501_v42, %v3280_v60  ;;  %v1448_v60 = vmul.f32 %v3501_v42, %v3324_v26 }
  0xfb   : > { %1535 = vrot.lane.b32.xlu1 %v1528_v1, %s2857_s27  ;;  %v1647_v1 = vmul.f32 %v3501_v42, %v3269_v53 }
  0xfc   : > { %v3503_v47 = vpop.permute.xlu0 %788  ;;  %v3505_v37 = vpop.permute.xlu1 %1957 }
  0xfe   : > { %1414 = vrot.lane.b32.xlu0 %v1407_v13, %s2860_s18 }
  0xff   : > { %1454 = vrot.lane.b32.xlu1 %v1447_v16, %s2859_s22  ;;  %v1489_v16 = vmul.f32 %v3501_v42, %v3313_v21  ;;  %v1363_v21 = vsel %vm666_vm5, %v3331_v29, %v3345_v36 }
 0x100   : > { %v3517_v59 = vpop.permute.xlu0 %1959  ;;  %v1368_v25 = vmul.f32 %v1363_v21, %v3400_v17  ;;  %v1330_v21 = vmul.f32 %v3501_v42, %v3353_v41 }
 0x102   : > { %1696 = vrot.lane.b32.xlu0 %v1688_v19, %s2853_s20  ;;  %s2868_s20 = smov 61  }
 0x103   : > { %v3513_v52 = vpop.permute.xlu1 %2226  ;;  %639 = vrot.lane.b32.xlu1 %v631_v4, %s2851_s26  ;;  %v1408_v4 = vmul.f32 %v3501_v42, %v3333_v30  ;;  %v1324_v30 = vsel %vm624_vm3, %v3343_v35, %v3353_v41  ;;  %v1243_v41 = vsel %vm4054_vm1, %v3358_v45, %v3365_v50  ;;  %vm725_vm1 = vcmask 891904  }
 0x106   : > { %1615 = vrot.lane.b32.xlu0 %v1607_v62, %s2855_s16 }
 0x107   : > { %v3523_v3 = vpop.permute.xlu1 %2259  ;;  %1655 = vrot.lane.b32.xlu1 %v1647_v1, %s2854_s23  ;;  %v1369_v1 = vmul.f32 %v3501_v42, %v3345_v36  ;;  %s2869_s23 = smov 62  }
 0x108   : > { %v3527_v39 = vpop.permute.xlu0 %2257 }
 0x10a   : > { %1537 = vrot.lane.b32.xlu0 %v1529_v48, %s2857_s27 }
 0x10b   : > { %v3533_v13 = vpop.permute.xlu1 %2224  ;;  %1576 = vrot.lane.b32.xlu1 %v1568_v5, %s2856_s15 }
 0x10c   : > { %v3537_v53 = vpop.permute.xlu0 %2290 }
 0x10e   : > { %1456 = vrot.lane.b32.xlu0 %v1448_v60, %s2859_s22  ;;  %v1329_v60 = vmul.f32 %v1324_v30, %v3400_v17  ;;  %v1290_v30 = vmul.f32 %v3501_v42, %v3360_v46 }
 0x10f   : > { %v3543_v19 = vpop.permute.xlu1 %2357  ;;  %1497 = vrot.lane.b32.xlu1 %v1489_v16, %s2858_s21  ;;  %v1367_v16 = vmul.f32 %v3331_v29, %v3398_v28  ;;  %v1284_v29 = vsel %vm1283_vm14, %v3351_v40, %v3360_v46 }
 0x110   : > { %v3547_v7 = vpop.permute.xlu0 %2324 }
 0x112   : > { %1412 = vrot.lane.b32.xlu0 %v1406_v14, %s2860_s18 }
 0x113   : > { %v3553_v62 = vpop.permute.xlu1 %745  ;;  %1416 = vrot.lane.b32.xlu1 %v1408_v4, %s2860_s18  ;;  %v1328_v4 = vmul.f32 %v3343_v35, %v3398_v28  ;;  %v1289_v35 = vmul.f32 %v1284_v29, %v3400_v17 }
 0x114   : > { %v3560_v26 = vpop.permute.xlu0 %2359 }
 0x116   : > { %1377 = vrot.lane.b32.xlu0 %v1369_v1, %s2852_s17 }
 0x117   : > { %v3565_v48 = vpop.permute.xlu1 %1916  ;;  %1375 = vrot.lane.b32.xlu1 %v1368_v25, %s2852_s17 }
 0x118   : > { %v3572_v5 = vpop.permute.xlu0 %747 }
 0x11a   : > { %1336 = vrot.lane.b32.xlu0 %v1329_v60, %s2851_s26 }
 0x11b   : > { %v3577_v36 = vpop.permute.xlu1 %2292  ;;  %1373 = vrot.lane.b32.xlu1 %v1367_v16, %s2852_s17 }
 0x11c   : > { %v3581_v14 = vpop.permute.xlu0 %1918 }
 0x11e   : > { %1334 = vrot.lane.b32.xlu0 %v1328_v4, %s2851_s26  ;;  %v1248_v4 = vmul.f32 %v1243_v41, %v3400_v17  ;;  %v1202_v41 = vsel %vm1201_vm15, %v3363_v49, %v3371_v57  ;;  %vm1880_vm15 = vcmask 523264  }
 0x11f   : > { %v3587_v1 = vpop.permute.xlu1 %2393  ;;  %1338 = vrot.lane.b32.xlu1 %v1330_v21, %s2851_s26  ;;  %v1288_v21 = vmul.f32 %v3351_v40, %v3398_v28  ;;  %s2861_s26 = smov 124  }
 0x120   : > { %v3594_v25 = vpop.permute.xlu0 %2391 }
 0x122   : > { %1298 = vrot.lane.b32.xlu0 %v1290_v30, %s2849_s29  ;;  %v1247_v30 = vmul.f32 %v3358_v45, %v3398_v28 }
 0x123   : > { %v3602_v60 = vpop.permute.xlu1 %706  ;;  %1296 = vrot.lane.b32.xlu1 %v1289_v35, %s2849_s29  ;;  %v1249_v35 = vmul.f32 %v3501_v42, %v3365_v50 }
 0x124   : > { %v3606_v16 = vpop.permute.xlu0 %704 }
 0x126   : > { %1255 = vrot.lane.b32.xlu0 %v1248_v4, %s2861_s26  ;;  %v1208_v4 = vmul.f32 %v3501_v42, %v3371_v57 }
 0x127   : > { %1294 = vrot.lane.b32.xlu1 %v1288_v21, %s2849_s29  ;;  %v3614_v29 = vpop.permute.xlu1 %1878  ;;  %v1207_v21 = vmul.f32 %v1202_v41, %v3400_v17  ;;  %s2862_s29 = smov 125  }
 0x128   : > { %v3612_v46 = vpop.permute.xlu0 %1876 }
 0x12a   : > { %1253 = vrot.lane.b32.xlu0 %v1247_v30, %s2861_s26  ;;  %v1165_v30 = vmul.f32 %v1160_v6, %v3400_v17  ;;  %v955_v6 = vsel %vm954_vm10, %v3380_v12, %v3404_v32 }
 0x12b   : > { %1257 = vrot.lane.b32.xlu1 %v1249_v35, %s2861_s26  ;;  %v3629_v45 = vpop.permute.xlu1 %2426  ;;  %v1206_v35 = vmul.f32 %v3363_v49, %v3398_v28  ;;  %v960_v49 = vmul.f32 %v955_v6, %v3377_v11 }
 0x12c   : > { %v3622_v40 = vpop.permute.xlu0 %2326 }
 0x12e   : > { %1216 = vrot.lane.b32.xlu0 %v1208_v4, %s2862_s29  ;;  %v1166_v4 = vmul.f32 %v3501_v42, %v3382_v15  ;;  %v1124_v15 = vmul.f32 %v3501_v42, %v3418_v58 }
 0x12f   : > { %1214 = vrot.lane.b32.xlu1 %v1207_v21, %s2862_s29  ;;  %v3636_v57 = vpop.permute.xlu1 %1835  ;;  %v961_v21 = vmul.f32 %v3404_v32, %v3499_v20  ;;  %v959_v32 = vmul.f32 %v3380_v12, %v3375_v8  ;;  %v920_v12 = vmul.f32 %v3430_v22, %v3499_v20 }
 0x130   : > { %v3631_v50 = vpop.permute.xlu0 %2428 }
 0x132   : > { %1172 = vrot.lane.b32.xlu0 %v1165_v30, %s2863_s19  ;;  %v1118_v30 = vsel %vm1117_vm12, %v3402_v31, %v3418_v58 }
 0x133   : > { %1212 = vrot.lane.b32.xlu1 %v1206_v35, %s2862_s29  ;;  %v3653_v56 = vpop.permute.xlu1 %2460 }
 0x134   : > { %v3638_v41 = vpop.permute.xlu0 %1837 }
 0x136   : > { %1170 = vrot.lane.b32.xlu0 %v1164_v9, %s2863_s19  ;;  %v1123_v9 = vmul.f32 %v1118_v30, %v3400_v17 }
 0x137   : > { %1174 = vrot.lane.b32.xlu1 %v1166_v4, %s2863_s19  ;;  %v1122_v4 = vmul.f32 %v3402_v31, %v3398_v28  ;;  %v3668_v6 = vpop.permute.xlu1 %1796  ;;  %v873_v31 = vsel %vm872_vm8, %v3444_v54, %v3428_v18 }
 0x138   : > { %v3655_v35 = vpop.permute.xlu0 %2462 }
 0x13a   : > { %969 = vrot.lane.b32.xlu0 %v961_v21, %s2864_s24 }
 0x13b   : > { %967 = vrot.lane.b32.xlu1 %v960_v49, %s2864_s24  ;;  %v914_v49 = vsel %vm913_vm9, %v3416_v55, %v3430_v22  ;;  %v3683_v30 = vpop.permute.xlu1 %1757  ;;  %v2043_v22 = vsel %vm602_vm13, %v3459_v0, %v3442_v33  ;;  %vm2002_vm13 = vcmask 547840  }
 0x13c   : > { %v3670_v21 = vpop.permute.xlu0 %1798  ;;  %v919_v58 = vmul.f32 %v914_v49, %v3377_v11  ;;  %v2048_v49 = vmul.f32 %v2043_v22, %v3400_v17  ;;  %v2047_v22 = vmul.f32 %v3459_v0, %v3398_v28 }
 0x13e   : > { %1132 = vrot.lane.b32.xlu0 %v1124_v15, %s2845_s28  ;;  %v918_v15 = vmul.f32 %v3416_v55, %v3375_v8  ;;  %v2049_v55 = vmul.f32 %v3442_v33, %v3501_v42 }
 0x13f   : > { %1130 = vrot.lane.b32.xlu1 %v1123_v9, %s2845_s28 }
 0x140   : > { %v3685_v9 = vpop.permute.xlu0 %1759 }
 0x142   : > { %1128 = vrot.lane.b32.xlu0 %v1122_v4, %s2845_s28  ;;  %s2866_s28 = smov 79   ;;  %v879_v4 = vmul.f32 %v3428_v18, %v3499_v20  ;;  %v832_v18 = vsel %vm831_vm6, %v3457_v2, %v3473_v27  ;;  %vm1961_vm6 = vcmask 539648  }
 0x143   : > { %965 = vrot.lane.b32.xlu1 %v959_v32, %s2864_s24  ;;  %v878_v32 = vmul.f32 %v873_v31, %v3377_v11  ;;  %v877_v31 = vmul.f32 %v3444_v54, %v3375_v8  ;;  %v837_v33 = vmul.f32 %v832_v18, %v3377_v11  ;;  %v836_v18 = vmul.f32 %v3457_v2, %v3375_v8 }
 0x146   : > { %928 = vrot.lane.b32.xlu0 %v920_v12, %s2865_s11  ;;  %v3702_v12 = vpop.permute.xlu0 %1720 }
 0x147   : > { %926 = vrot.lane.b32.xlu1 %v919_v58, %s2865_s11  ;;  %v3700_v58 = vpop.permute.xlu1 %1718 }
 0x14a   : > { %885 = vrot.lane.b32.xlu0 %v878_v32, %s2866_s28 }
 0x14b   : > { %924 = vrot.lane.b32.xlu1 %v918_v15, %s2865_s11 }
 0x14e   : > { %2055 = vrot.lane.b32.xlu0 %v2048_v49, %s2867_s25  ;;  %v2003_v49 = vsel %vm2002_vm13, %v3471_v23, %v3484_v51  ;;  %vm807_vm13 = vcmask 769024  }
 0x14f   : > { %887 = vrot.lane.b32.xlu1 %v879_v4, %s2866_s28 }
 0x150   : > { %v3709_v15 = vpop.permute.xlu0 %677  ;;  %v3711_v32 = vpop.permute.xlu1 %635 }
 0x151   : > { %4060 = vst [vmem:[#allocation10_spill] sm:$0xff] %v3709_v15  ;;  %4061 = vst [vmem:[#allocation11_spill] sm:$0xff] %v3711_v32  ;;  %v838_v32 = vmul.f32 %v3499_v20, %v3473_v27  ;;  %v791_v27 = vsel %vm790_vm2, %v3486_v61, %v3503_v47  ;;  %v797_v15 = vmul.f32 %v3499_v20, %v3503_v47  ;;  %vm1920_vm2 = vcmask 531456  }
 0x152   : > { %883 = vrot.lane.b32.xlu0 %v877_v31, %s2866_s28  ;;  %v796_v2 = vmul.f32 %v791_v27, %v3377_v11  ;;  %v1968_v27 = vmul.f32 %v3501_v42, %v3517_v59  ;;  %v750_v47 = vsel %vm749_vm7, %v3553_v62, %v3572_v5  ;;  %vm1698_vm7 = vcmask 654336  }
 0x153   : > { %2057 = vrot.lane.b32.xlu1 %v2049_v55, %s2867_s25  ;;  %v2008_v55 = vmul.f32 %v2003_v49, %v3400_v17 }
 0x154   : > { %v3720_v4 = vpop.permute.xlu0 %637 }
 0x155   : > { %4062 = vst [vmem:[#allocation12_spill] sm:$0xff] %v3720_v4  ;;  %v3722_v54 = vpop.permute.xlu1 %1692 }
 0x156   : > { %844 = vrot.lane.b32.xlu0 %v837_v33, %s2855_s16  ;;  %v2009_v33 = vmul.f32 %v3501_v42, %v3484_v51 }
 0x157   : > { %2053 = vrot.lane.b32.xlu1 %v2047_v22, %s2867_s25 }
 0x158   : > { %v3730_v31 = vpop.permute.xlu0 %1651 }
 0x159   : > { %v3732_v0 = vpop.permute.xlu1 %1611 }
 0x15a   : > { %2015 = vrot.lane.b32.xlu0 %v2008_v55, %s2868_s20  ;;  %v1962_v55 = vsel %vm1961_vm6, %v3505_v37, %v3517_v59  ;;  %v1921_v59 = vsel %vm1920_vm2, %v3565_v48, %v3581_v14  ;;  %vm766_vm6 = vcmask 777216   ;;  %vm1499_vm2 = vcmask 785408  }
 0x15b   : > { %846 = vrot.lane.b32.xlu1 %v838_v32, %s2855_s16  ;;  %v2007_v32 = vmul.f32 %v3471_v23, %v3398_v28  ;;  %v795_v23 = vmul.f32 %v3486_v61, %v3375_v8 }
 0x15c   : > { %v3739_v22 = vpop.permute.xlu0 %1572 }
 0x15d   : > { %v3741_v4 = vpop.permute.xlu1 %1533 }
 0x15e   : > { %842 = vrot.lane.b32.xlu0 %v836_v18, %s2855_s16  ;;  %v1967_v18 = vmul.f32 %v1962_v55, %v3400_v17  ;;  %s2870_s16 = smov 63  }
 0x15f   : > { %2017 = vrot.lane.b32.xlu1 %v2009_v33, %s2868_s20 }
 0x160   : > { %v3750_v49 = vpop.permute.xlu0 %1493 }
 0x161   : > { %v3752_v51 = vpop.permute.xlu1 %1452 }
 0x162   : > { %803 = vrot.lane.b32.xlu0 %v796_v2, %s2856_s15 }
 0x163   : > { %2013 = vrot.lane.b32.xlu1 %v2007_v32, %s2868_s20  ;;  %v1966_v32 = vmul.f32 %v3505_v37, %v3398_v28  ;;  %v754_v37 = vmul.f32 %v3553_v62, %v3375_v8  ;;  %v1925_v62 = vmul.f32 %v3565_v48, %v3398_v28 }
 0x164   : > { %v1654_v33 = vpop.permute.xlu0 %1653 }
 0x165   : > { %v1695_v10 = vpop.permute.xlu1 %1694 }
 0x166   : > { %1974 = vrot.lane.b32.xlu0 %v1967_v18, %s2869_s23  ;;  %v756_v18 = vmul.f32 %v3499_v20, %v3572_v5  ;;  %v709_v5 = vsel %vm708_vm4, %v3606_v16, %v3602_v60  ;;  %vm848_vm4 = vcmask 760832  }
 0x167   : > { %805 = vrot.lane.b32.xlu1 %v797_v15, %s2856_s15  ;;  %v755_v15 = vmul.f32 %v750_v47, %v3377_v11  ;;  %v1927_v47 = vmul.f32 %v3501_v42, %v3581_v14  ;;  %v714_v14 = vmul.f32 %v709_v5, %v3377_v11 }
 0x168   : > { %v1575_v34 = vpop.permute.xlu0 %1574 }
 0x169   : > { %v1614_v2 = vpop.permute.xlu1 %1613 }
 0x16a   : > { %801 = vrot.lane.b32.xlu0 %v795_v23, %s2856_s15  ;;  %v1926_v23 = vmul.f32 %v1921_v59, %v3400_v17 }
 0x16b   : > { %1976 = vrot.lane.b32.xlu1 %v1968_v27, %s2869_s23 }
 0x16c   : > { %v3772_v55 = vpop.permute.xlu0 %1495 }
 0x16d   : > { %v1536_v61 = vpop.permute.xlu1 %1535 }
 0x16e   : > { %762 = vrot.lane.b32.xlu0 %v755_v15, %s2857_s27 }
 0x16f   : > { %1972 = vrot.lane.b32.xlu1 %v1966_v32, %s2869_s23 }
 0x170   : > { %v3780_v27 = vpop.permute.xlu0 %1414 }
 0x171   : > { %v3782_v44 = vpop.permute.xlu1 %1454 }
 0x172   : > { %1933 = vrot.lane.b32.xlu0 %v1926_v23, %s2870_s16 }
 0x173   : > { %764 = vrot.lane.b32.xlu1 %v756_v18, %s2857_s27  ;;  %v1699_v18 = vsel %vm1698_vm7, %v3722_v54, %v1695_v10 }
 0x174   : > { %v1697_v32 = vpop.permute.xlu0 %1696 }
 0x175   : > { %v3789_v15 = vpop.permute.xlu1 %639  ;;  %v1700_v59 = vsel %vm1698_vm7, %v1695_v10, %v1697_v32  ;;  %v1881_v32 = vsel %vm1880_vm15, %v3612_v46, %v3614_v29  ;;  %v1658_v10 = vsel %vm1657_vm11, %v3730_v31, %v1654_v33  ;;  %v1578_v31 = vsel %vm807_vm13, %v3739_v22, %v1575_v34 }
 0x176   : > { %4063 = vst [vmem:[#allocation13_spill] sm:$0xff] %v3789_v15  ;;  %760 = vrot.lane.b32.xlu0 %v754_v37, %s2857_s27  ;;  %2127 = vmatprep.subr.mxu1 %v1700_v59  ;;  %v1886_v48 = vmul.f32 %v1881_v32, %v3400_v17  ;;  %v1887_v59 = vmul.f32 %v3501_v42, %v3614_v29  ;;  %vm1839_vm7 = vcmask 424960   ;;  %s2871_s27 = smov 76  }
 0x177   : > { %1935 = vrot.lane.b32.xlu1 %v1927_v47, %s2870_s16  ;;  %2128 = vmatpush1.msra.mxu1 %v1699_v18  ;;  %v715_v47 = vmul.f32 %v3499_v20, %v3602_v60  ;;  %v713_v60 = vmul.f32 %v3606_v16, %v3375_v8  ;;  %v1539_v18 = vsel %vm766_vm6, %v3741_v4, %v1536_v61  ;;  %v2261_v16 = vrot.slane %v3527_v39, 4 }
 0x178   : > { %v1616_v23 = vpop.permute.xlu0 %1615  ;;  %v667_v8 = vsel %vm666_vm5, %v3253_v43, %v3243_v38  ;;  %v1500_v4 = vsel %vm1499_vm2, %v3750_v49, %v3772_v55  ;;  %v1885_v22 = vmul.f32 %v3612_v46, %v3398_v28  ;;  %vm683_vm5 = vcmask 900096  }
 0x179   : > { %v1656_v15 = vpop.permute.xlu1 %1655  ;;  %v1618_v54 = vsel %vm848_vm4, %v1614_v2, %v1616_v23 }
 0x17a   : > { %v1659_v24 = vsel %vm1657_vm11, %v1654_v33, %v1656_v15  ;;  %721 = vrot.lane.b32.xlu0 %v714_v14, %s2860_s18  ;;  %v1617_v15 = vsel %vm848_vm4, %v3732_v0, %v1614_v2  ;;  %vm1458_vm11 = vcmask 883712  }
 0x17b   : > { %1931 = vrot.lane.b32.xlu1 %v1925_v62, %s2870_s16  ;;  %2129 = vmatprep.subr.mxu1 %v1659_v24  ;;  %v2228_v24 = vrot.slane %v3533_v13, 4  ;;  %v1459_v32 = vsel %vm1458_vm11, %v3752_v51, %v3782_v44  ;;  %s2746_s16 = smul.u32 48, %s4076_s14 }
 0x17c   : > { %2130 = vmatpush1.msra.mxu1 %v1658_v10  ;;  %v1538_v11 = vpop.permute.xlu0 %1537 }
 0x17d   : > { %v1577_v37 = vpop.permute.xlu1 %1576  ;;  %2131 = vmatprep.subr.mxu1 %v1618_v54  ;;  %v1540_v0 = vsel %vm766_vm6, %v1536_v61, %v1538_v11  ;;  %v2229_v29 = vsel %vm624_vm3, %v2228_v24, %v3533_v13  ;;  %v1840_v13 = vsel %vm1839_vm7, %v3636_v57, %v3638_v41  ;;  %v2294_v11 = vrot.slane %v3537_v53, 4 }
 0x17e   : > { %v1579_v5 = vsel %vm807_vm13, %v1575_v34, %v1577_v37  ;;  %2132 = vmatpush1.msra.mxu1 %v1617_v15  ;;  %1893 = vrot.lane.b32.xlu0 %v1886_v48, %s2848_s12  ;;  %v649_v34 = vld [vmem:[#allocation2 + $0x8] sm:$0xff]  ;;  %v2262_v48 = vsel %vm1283_vm14, %v2261_v16, %v3527_v39  ;;  %v1845_v51 = vmul.f32 %v1840_v13, %v3400_v17  ;;  %vm1003_vm7 = vcmask 588800  }
 0x17f   : > { %723 = vrot.lane.b32.xlu1 %v715_v47, %s2860_s18  ;;  %2133 = vmatprep.subr.mxu1 %v1579_v5  ;;  %v672_v23 = vmul.f32 %v667_v8, %v649_v34  ;;  %v673_v37 = vmul.f32 %v3499_v20, %v3243_v38  ;;  %v2811_v15 = vld [vmem:[%s2965_s30 + $0x8] sm:$0xf]  ;;  %v2361_v38 = vrot.slane %v3543_v19, 4  ;;  %v2362_v20 = vrot.slane %v3560_v26, 4 }
 0x180   : > { %2134 = vmatpush1.msra.mxu1 %v1578_v31  ;;  %v1457_v33 = vpop.permute.xlu0 %1456  ;;  %v2263_v31 = vsel %vm1283_vm14, %v2261_v16, %v3523_v3  ;;  %vm641_vm14 = vcmask 908288   ;;  %v2395_v34 = vrot.slane %v3594_v25, 4 }
 0x181   : > { %v1498_v2 = vpop.permute.xlu1 %1497  ;;  %2135 = vmatprep.subr.mxu1 %v1540_v0  ;;  %v1460_v43 = vsel %vm1458_vm11, %v3782_v44, %v1457_v33  ;;  %v2230_v44 = vsel %vm624_vm3, %v2228_v24, %v3513_v52  ;;  %v2328_v24 = vrot.slane %v3547_v7, 4  ;;  %vm1134_vm3 = vcmask 1039360  }
 0x182   : > { %v1501_v62 = vsel %vm1499_vm2, %v3772_v55, %v1498_v2  ;;  %2136 = vmatpush1.msra.mxu1 %v1539_v18  ;;  %719 = vrot.lane.b32.xlu0 %v713_v60, %s2860_s18  ;;  %v2810_v55 = vld [vmem:[%s2965_s30] sm:$0xff]  ;;  %vm2295_vm2 = vcmask 121856   ;;  %v2234_v5 = vmax.f32 %v2811_v15, %v2230_v44  ;;  %v1844_v60 = vmul.f32 %v3636_v57, %v3398_v28 }
 0x183   : > { %1895 = vrot.lane.b32.xlu1 %v1887_v59, %s2848_s12  ;;  %2137 = vmatprep.subr.mxu1 %v1501_v62  ;;  %v2233_v10 = vmax.f32 %v2810_v55, %v2229_v29  ;;  %v2296_v52 = vsel %vm2295_vm2, %v2294_v11, %v3537_v53  ;;  %v2297_v2 = vsel %vm2295_vm2, %v2294_v11, %v3577_v36  ;;  %v2396_v36 = vrot.slane %v3587_v1, 4 }
 0x184   : > { %2138 = vmatpush1.msra.mxu1 %v1500_v4  ;;  %v1413_v61 = vpop.permute.xlu0 %1412  ;;  %v1846_v53 = vmul.f32 %v3501_v42, %v3638_v41  ;;  %v2267_v18 = vmax.f32 %v2234_v5, %v2263_v31  ;;  %v1800_v62 = vsel %vm954_vm10, %v3668_v6, %v3670_v21  ;;  %v2329_v57 = vsel %vm1117_vm12, %v2328_v24, %v3547_v7 }
 0x185   : > { %v1417_v14 = vpop.permute.xlu1 %1416  ;;  %2139 = vmatprep.subr.mxu1 %v1460_v43  ;;  %v1418_v46 = vsel %vm725_vm1, %v1413_v61, %v3780_v27  ;;  %v2266_v39 = vmax.f32 %v2233_v10, %v2262_v48  ;;  %v2330_v41 = vsel %vm1117_vm12, %v2328_v24, %v3622_v40  ;;  %v2363_v8 = vsel %vm396_vm0, %v2361_v38, %v2362_v20 }
 0x186   : > { %v1419_v49 = vsel %vm725_vm1, %v3780_v27, %v1417_v14  ;;  %2140 = vmatpush1.msra.mxu1 %v1459_v32  ;;  %679 = vrot.lane.b32.xlu0 %v672_v23, %s2852_s17  ;;  %v2301_v16 = vmax.f32 %v2267_v18, %v2297_v2  ;;  %v2431_v29 = vrot.slane %v3631_v50, 4  ;;  %v1806_v4 = vmul.f32 %v3501_v42, %v3670_v21 }
 0x187   : > { %1891 = vrot.lane.b32.xlu1 %v1885_v22, %s2848_s12  ;;  %2141 = vmatprep.subr.mxu1 %v1419_v49  ;;  %v2300_v59 = vmax.f32 %v2266_v39, %v2296_v52  ;;  %v1805_v7 = vmul.f32 %v1800_v62, %v3400_v17  ;;  %v1761_v43 = vsel %vm913_vm9, %v3683_v30, %v3685_v9  ;;  %vm2398_vm10 = vcmask 924672   ;;  %s4024_s12 = scalar_lea.vmem %s4049_s10, %s2746_s16 }
 0x188   : > { %2142 = vmatpush1.msra.mxu1 %v1418_v46  ;;  %v1378_v27 = vpop.permute.xlu0 %1377  ;;  %v2334_v23 = vmax.f32 %v2301_v16, %v2330_v41  ;;  %v2397_v13 = vsel %vm396_vm0, %v2395_v34, %v2396_v36  ;;  %v2430_v21 = vrot.slane %v3629_v45, 4  ;;  %v2465_v32 = vrot.slane %v3655_v35, 4 }
 0x189   : > { %v1376_v54 = vpop.permute.xlu1 %1375  ;;  %v2333_v49 = vmax.f32 %v2300_v59, %v2329_v57  ;;  %v2364_v46 = vsel %vm1134_vm3, %v3543_v19, %v2363_v8  ;;  %v1766_v55 = vmul.f32 %v1761_v43, %v3400_v17  ;;  %vm1300_vm9 = vcmask 916480   ;;  %v4064_v57 = vld [vmem:[#allocation7_spill] sm:$0xff]  ;;  %v4066_v43 = vld [vmem:[#allocation8_spill] sm:$0xff] }
 0x18a   : > { %v1380_v47 = vsel %vm683_vm5, %v1376_v54, %v1378_v27  ;;  %1852 = vrot.lane.b32.xlu0 %v1845_v51, %s2871_s27  ;;  %v2432_v11 = vsel %vm396_vm0, %v2430_v21, %v2431_v29  ;;  %v2464_v44 = vrot.slane %v3653_v56, 4  ;;  %v1804_v51 = vmul.f32 %v3668_v6, %v3398_v28  ;;  %v4065_v29 = vld [vmem:[#allocation9_spill] sm:$0xff] }
 0x18b   : > { %2143 = vmatprep.subr.mxu1 %v1380_v47  ;;  %681 = vrot.lane.b32.xlu1 %v673_v37, %s2852_s17  ;;  %v2368_v37 = vmax.f32 %v2334_v23, %v3560_v26  ;;  %v2367_v19 = vmax.f32 %v2333_v49, %v2364_v46  ;;  %v1765_v39 = vmul.f32 %v3683_v30, %v3398_v28  ;;  %vm1259_vm12 = vcmask 1014784   ;;  %v2691_v23 = vld [vmem:[%s4040_s1 + $0x3] ss:$8 sm:$0x3] }
 0x18c   : > { %v1337_v33 = vpop.permute.xlu0 %1336  ;;  %v2466_v47 = vsel %vm396_vm0, %v2464_v44, %v2465_v32  ;;  %v2433_v6 = vsel %vm1300_vm9, %v3629_v45, %v2432_v11  ;;  %v1767_v26 = vmul.f32 %v3501_v42, %v3685_v9  ;;  %v1722_v31 = vsel %vm872_vm8, %v3700_v58, %v3702_v12  ;;  %v2067_v9 = vld [vmem:[%s4045_s6 + $0x8] sm:$0xff]  ;;  %v1080_v44 = vld [vmem:[#allocation2 + $0x18] sm:$0xff] }
 0x18d   : > { %v1374_v0 = vpop.permute.xlu1 %1373  ;;  %v2403_v24 = vmax.f32 %v2368_v37, %v3587_v1  ;;  %v2467_v30 = vsel %vm641_vm14, %v3653_v56, %v2466_v47  ;;  %v1728_v1 = vmul.f32 %v3501_v42, %v3702_v12  ;;  %2716 = vmatprep.mubr.msk.f32.mxu1 %vm1003_vm7, %v2067_v9  ;;  %v1727_v56 = vmul.f32 %v1722_v31, %v3400_v17 }
 0x18e   : > { %v1379_v3 = vsel %vm683_vm5, %v1374_v0, %v1376_v54  ;;  %1850 = vrot.lane.b32.xlu0 %v1844_v60, %s2871_s27  ;;  %v2399_v54 = vsel %vm2398_vm10, %v3594_v25, %v2397_v13  ;;  %vm1218_vm8 = vcmask 1022976   ;;  %v1726_v18 = vmul.f32 %v3700_v58, %v3398_v28  ;;  %v997_v28 = vld [vmem:[%s4044_s5] sm:$0xff] }
 0x18f   : > { %2144 = vmatpush1.msra.mxu1 %v1379_v3  ;;  %1854 = vrot.lane.b32.xlu1 %v1846_v53, %s2871_s27  ;;  %v2402_v52 = vmax.f32 %v2367_v19, %v2399_v54  ;;  %v2437_v2 = vmax.f32 %v2403_v24, %v3631_v50  ;;  %vm1176_vm11 = vcmask 1031168   ;;  %v482_v36 = vadd.f32 %v4064_v57, %v3196_v63 }
 0x190   : > { %v1335_v22 = vpop.permute.xlu0 %1334  ;;  %vm971_vm2 = vcmask 629760   ;;  %vm930_vm10 = vcmask 637952  }
 0x191   : > { %v1339_v61 = vpop.permute.xlu1 %1338  ;;  %v1340_v40 = vsel %vm641_vm14, %v1335_v22, %v1337_v33  ;;  %v2436_v45 = vmax.f32 %v2402_v52, %v2433_v6  ;;  %v2471_v42 = vmax.f32 %v2437_v2, %v3655_v35  ;;  %v2118_v35 = vld [vmem:[%s4046_s7] sm:$0xff]  ;;  %v572_v16 = vmax.f32 %v482_v36, 0.0 }
 0x192   : > { %v1341_v14 = vsel %vm641_vm14, %v1337_v33, %v1339_v61  ;;  %1814 = vrot.lane.b32.xlu0 %v1806_v4, %s2864_s24  ;;  %v563_v4 = vadd.f32 %v4065_v29, %v3196_v63 }
 0x193   : > { %2145 = vmatprep.subr.mxu1 %v1341_v14  ;;  %1812 = vrot.lane.b32.xlu1 %v1805_v7, %s2864_s24  ;;  %v2470_v60 = vmax.f32 %v2436_v45, %v2467_v30  ;;  %v2473_v7 = vld [vmem:[%s4048_s9] sm:$0xf]  ;;  %v484_v14 = vadd.f32 %v4066_v43, %v3196_v63 }
 0x194   : > { %2146 = vmatpush1.msra.mxu1 %v1340_v40  ;;  %v1299_v10 = vpop.permute.xlu0 %1298  ;;  %v574_v13 = vmax.f32 %v563_v4, 0.0  ;;  %v1081_v63 = vld [vmem:[#allocation2 + $0x20] sm:$0xff] }
 0x195   : > { %v1297_v48 = vpop.permute.xlu1 %1296  ;;  %v2481_v3 = vcombine.high %v2470_v60, %v2470_v60  ;;  %v573_v49 = vmax.f32 %v484_v14, 0.0 }
 0x196   : > { %v1302_v27 = vsel %vm1300_vm9, %v1297_v48, %v1299_v10  ;;  %1773 = vrot.lane.b32.xlu0 %v1766_v55, %s2865_s11  ;;  %v4067_v55 = vld [vmem:[#allocation6_spill] sm:$0xff] }
 0x197   : > { %2147 = vmatprep.subr.mxu1 %v1302_v27  ;;  %1810 = vrot.lane.b32.xlu1 %v1804_v51, %s2864_s24  ;;  %v1092_v10 = vrot.slane %v2691_v23, %v4067_v55 }
 0x198   : > { %v1256_v15 = vpop.permute.xlu0 %1255 }
 0x199   : > { %v1295_v5 = vpop.permute.xlu1 %1294  ;;  %v1096_v19 = vmul.f32 %v1092_v10, %v1081_v63 }
 0x19a   : > { %v1301_v25 = vsel %vm1300_vm9, %v1295_v5, %v1297_v48  ;;  %1771 = vrot.lane.b32.xlu0 %v1765_v39, %s2865_s11  ;;  %v4068_v48 = vld [vmem:[#allocation5_spill] sm:$0xff]  ;;  %vm889_vm9 = vcmask 646144  }
 0x19b   : > { %2148 = vmatpush1.msra.mxu1 %v1301_v25  ;;  %1775 = vrot.lane.b32.xlu1 %v1767_v26, %s2865_s11  ;;  %v1088_v11 = vrot.slane %v2691_v23, %v4068_v48 }
 0x19c   : > { %v1254_v38 = vpop.permute.xlu0 %1253 }
 0x19d   : > { %v1258_v20 = vpop.permute.xlu1 %1257  ;;  %v1260_v0 = vsel %vm1259_vm12, %v1254_v38, %v1256_v15  ;;  %v1095_v47 = vmul.f32 %v1088_v11, %v1080_v44 }
 0x19e   : > { %v1261_v33 = vsel %vm1259_vm12, %v1256_v15, %v1258_v20  ;;  %1736 = vrot.lane.b32.xlu0 %v1728_v1, %s2866_s28  ;;  %vm2019_vm12 = vcmask 498688  }
 0x19f   : > { %2149 = vmatprep.subr.mxu1 %v1261_v33  ;;  %1734 = vrot.lane.b32.xlu1 %v1727_v56, %s2866_s28 }
 0x1a0   : > { %2150 = vmatpush1.msra.mxu1 %v1260_v0  ;;  %v1217_v12 = vpop.permute.xlu0 %1216 }
 0x1a1   : > { %v1215_v53 = vpop.permute.xlu1 %1214 }
 0x1a2   : > { %v1220_v59 = vsel %vm1218_vm8, %v1215_v53, %v1217_v12  ;;  %2486 = vrot.lane.b32.xlu0 %v2471_v42, %s2856_s15 }
 0x1a3   : > { %2151 = vmatprep.subr.mxu1 %v1220_v59  ;;  %2484 = vrot.lane.b32.xlu1 %v2481_v3, %s2856_s15 }
 0x1a4   : > { %v1173_v17 = vpop.permute.xlu0 %1172 }
 0x1a5   : > { %v1213_v50 = vpop.permute.xlu1 %1212 }
 0x1a6   : > { %v1219_v62 = vsel %vm1218_vm8, %v1213_v50, %v1215_v53  ;;  %2482 = vrot.lane.b32.xlu0 %v2470_v60, %s2856_s15  ;;  %vm1978_vm8 = vcmask 506880  }
 0x1a7   : > { %2152 = vmatpush1.msra.mxu1 %v1219_v62  ;;  %1732 = vrot.lane.b32.xlu1 %v1726_v18, %s2866_s28 }
 0x1a8   : > { %v1171_v34 = vpop.permute.xlu0 %1170 }
 0x1a9   : > { %v1175_v41 = vpop.permute.xlu1 %1174  ;;  %v1177_v8 = vsel %vm1176_vm11, %v1171_v34, %v1173_v17 }
 0x1aa   : > { %v1178_v58 = vsel %vm1176_vm11, %v1173_v17, %v1175_v41  ;;  %2121 = vperm.xlu0 %2807, %v2118_v35  }
 0x1ab   : > { %2153 = vmatprep.subr.mxu1 %v1178_v58  ;;  %1000 = vperm.xlu1 %2808, %v997_v28  }
 0x1ac   : > { %2154 = vmatpush1.msra.mxu1 %v1177_v8  ;;  %v970_v22 = vpop.permute.xlu0 %969 }
 0x1ad   : > { %v968_v61 = vpop.permute.xlu1 %967 }
 0x1ae   : > { %v973_v40 = vsel %vm971_vm2, %v968_v61, %v970_v22  ;;  %2573 = vrot.lane.b32.xlu0 %v572_v16, %s2856_s15 }
 0x1af   : > { %1021 = vmatprep.subr.mxu0 %v973_v40  ;;  %2476 = vperm.xlu1 %2808, %v2473_v7  }
 0x1b0   : > { %v1133_v21 = vpop.permute.xlu0 %1132 }
 0x1b1   : > { %v1131_v32 = vpop.permute.xlu1 %1130 }
 0x1b2   : > { %v1136_v46 = vsel %vm1134_vm3, %v1131_v32, %v1133_v21  ;;  %2577 = vrot.lane.b32.xlu0 %v574_v13, %s2856_s15 }
 0x1b3   : > { %2155 = vmatprep.subr.mxu1 %v1136_v46  ;;  %2575 = vrot.lane.b32.xlu1 %v573_v49, %s2856_s15 }
 0x1b4   : > { %v1129_v51 = vpop.permute.xlu0 %1128 }
 0x1b5   : > { %v966_v27 = vpop.permute.xlu1 %965  ;;  %v1135_v37 = vsel %vm1134_vm3, %v1129_v51, %v1131_v32  ;;  %vm2059_vm3 = vcmask 490496  }
 0x1b6   : > { %v972_v54 = vsel %vm971_vm2, %v966_v27, %v968_v61  ;;  %2156 = vmatpush1.msra.mxu1 %v1135_v37  ;;  %v4069_v27 = vld [vmem:[#allocation10_spill] sm:$0xff] }
 0x1b7   : > { %1022 = vmatpush1.msra.mxu0 %v972_v54  ;;  %2157 = vmatprep.subr.mxu1 %v1096_v19  ;;  %v4070_v19 = vld [vmem:[#allocation13_spill] sm:$0xff] }
 0x1b8   : > { %v929_v39 = vpop.permute.xlu0 %928  ;;  %2158 = vmatpush1.msra.mxu1 %v1095_v47  ;;  %v4071_v47 = vld [vmem:[#allocation12_spill] sm:$0xff] }
 0x1b9   : > { %v927_v6 = vpop.permute.xlu1 %926 }
 0x1ba   : > { %v932_v15 = vsel %vm930_vm10, %v927_v6, %v929_v39  ;;  %v643_v39 = vsel %vm641_vm14, %v4071_v47, %v4070_v19 }
 0x1bb   : > { %1023 = vmatprep.subr.mxu0 %v932_v15 }
 0x1bc   : > { %v886_v5 = vpop.permute.xlu0 %885 }
 0x1bd   : > { %v925_v52 = vpop.permute.xlu1 %924 }
 0x1be   : > { %v931_v26 = vsel %vm930_vm10, %v925_v52, %v927_v6  ;;  %v978_v6 = vld [vmem:[%s4043_s4] sm:$0xff] }
 0x1bf   : > { %1024 = vmatpush1.msra.mxu0 %v931_v26 }
 0x1c0   : > { %v2056_v25 = vpop.permute.xlu0 %2055 }
 0x1c1   : > { %v888_v24 = vpop.permute.xlu1 %887 }
 0x1c2   : > { %v891_v31 = vsel %vm889_vm9, %v886_v5, %v888_v24 }
 0x1c3   : > { %1025 = vmatprep.subr.mxu0 %v891_v31  ;;  %v4073_v31 = vmov 0.0  }
 0x1c4   : > { %v884_v30 = vpop.permute.xlu0 %883 }
 0x1c5   : > { %v2058_v45 = vpop.permute.xlu1 %2057  ;;  %v890_v9 = vsel %vm889_vm9, %v884_v30, %v886_v5  ;;  %v4072_v5 = vld [vmem:[#allocation11_spill] sm:$0xff] }
 0x1c6   : > { %v2061_v1 = vsel %vm2059_vm3, %v2056_v25, %v2058_v45  ;;  %1026 = vmatpush1.msra.mxu0 %v890_v9  ;;  %v642_v52 = vsel %vm641_vm14, %v4072_v5, %v4071_v47 }
 0x1c7   : > { %2173 = vmatprep.subr.mxu1 %v2061_v1 }
 0x1c8   : > { %v845_v38 = vpop.permute.xlu0 %844 }
 0x1c9   : > { %v2054_v20 = vpop.permute.xlu1 %2053 }
 0x1ca   : > { %v2060_v56 = vsel %vm2059_vm3, %v2054_v20, %v2056_v25 }
 0x1cb   : > { %2174 = vmatpush2.msra.mxu1 %v2060_v56 }
 0x1cc   : > { %v2016_v60 = vpop.permute.xlu0 %2015 }
 0x1cd   : > { %v847_v33 = vpop.permute.xlu1 %846 }
 0x1ce   : > { %v850_v0 = vsel %vm848_vm4, %v845_v38, %v847_v33 }
 0x1cf   : > { %1027 = vmatprep.subr.mxu0 %v850_v0 }
 0x1d0   : > { %v843_v2 = vpop.permute.xlu0 %842 }
 0x1d1   : > { %v2018_v42 = vpop.permute.xlu1 %2017  ;;  %v849_v12 = vsel %vm848_vm4, %v843_v2, %v845_v38  ;;  %vm1937_vm4 = vcmask 515072  }
 0x1d2   : > { %v2021_v53 = vsel %vm2019_vm12, %v2016_v60, %v2018_v42  ;;  %1028 = vmatpush1.msra.mxu0 %v849_v12 }
 0x1d3   : > { %2175 = vmatprep.subr.mxu1 %v2021_v53 }
 0x1d4   : > { %v804_v3 = vpop.permute.xlu0 %803 }
 0x1d5   : > { %v2014_v59 = vpop.permute.xlu1 %2013 }
 0x1d6   : > { %v2020_v17 = vsel %vm2019_vm12, %v2014_v59, %v2016_v60 }
 0x1d7   : > { %2176 = vmatpush2.msra.mxu1 %v2020_v17  ;;  %v2472_v17 = vld [vmem:[%s4047_s8] sm:$0xf] }
 0x1d8   : > { %v1975_v50 = vpop.permute.xlu0 %1974 }
 0x1d9   : > { %v806_v18 = vpop.permute.xlu1 %805 }
 0x1da   : > { %v809_v62 = vsel %vm807_vm13, %v804_v3, %v806_v18 }
 0x1db   : > { %1029 = vmatprep.subr.mxu0 %v809_v62  ;;  %v2066_v62 = vld [vmem:[%s4045_s6] sm:$0xff] }
 0x1dc   : > { %v802_v35 = vpop.permute.xlu0 %801 }
 0x1dd   : > { %v1977_v57 = vpop.permute.xlu1 %1976  ;;  %v808_v36 = vsel %vm807_vm13, %v802_v35, %v804_v3 }
 0x1de   : > { %v1980_v34 = vsel %vm1978_vm8, %v1975_v50, %v1977_v57  ;;  %1030 = vmatpush1.msra.mxu0 %v808_v36 }
 0x1df   : > { %2177 = vmatprep.subr.mxu1 %v1980_v34 }
 0x1e0   : > { %v763_v41 = vpop.permute.xlu0 %762 }
 0x1e1   : > { %v1973_v28 = vpop.permute.xlu1 %1972 }
 0x1e2   : > { %v1979_v58 = vsel %vm1978_vm8, %v1973_v28, %v1975_v50 }
 0x1e3   : > { %2178 = vmatpush2.msra.mxu1 %v1979_v58 }
 0x1e4   : > { %v1934_v8 = vpop.permute.xlu0 %1933 }
 0x1e5   : > { %v765_v16 = vpop.permute.xlu1 %764 }
 0x1e6   : > { %v768_v29 = vsel %vm766_vm6, %v763_v41, %v765_v16 }
 0x1e7   : > { %1031 = vmatprep.subr.mxu0 %v768_v29 }
 0x1e8   : > { %v761_v4 = vpop.permute.xlu0 %760 }
 0x1e9   : > { %v1936_v22 = vpop.permute.xlu1 %1935  ;;  %v767_v61 = vsel %vm766_vm6, %v761_v4, %v763_v41  ;;  %vm1856_vm6 = vcmask 621568  }
 0x1ea   : > { %v1939_v7 = vsel %vm1937_vm4, %v1934_v8, %v1936_v22  ;;  %1032 = vmatpush1.msra.mxu0 %v767_v61 }
 0x1eb   : > { %2179 = vmatprep.subr.mxu1 %v1939_v7 }
 0x1ec   : > { %v722_v43 = vpop.permute.xlu0 %721 }
 0x1ed   : > { %v1932_v14 = vpop.permute.xlu1 %1931 }
 0x1ee   : > { %v1938_v40 = vsel %vm1937_vm4, %v1932_v14, %v1934_v8 }
 0x1ef   : > { %2180 = vmatpush2.msra.mxu1 %v1938_v40 }
 0x1f0   : > { %v1894_v23 = vpop.permute.xlu0 %1893 }
 0x1f1   : > { %v724_v13 = vpop.permute.xlu1 %723 }
 0x1f2   : > { %v727_v21 = vsel %vm725_vm1, %v722_v43, %v724_v13 }
 0x1f3   : > { %1033 = vmatprep.subr.mxu0 %v727_v21 }
 0x1f4   : > { %v720_v32 = vpop.permute.xlu0 %719 }
 0x1f5   : > { %v726_v49 = vsel %vm725_vm1, %v720_v32, %v722_v43  ;;  %v1896_v46 = vpop.permute.xlu1 %1895  ;;  %vm4074_vm1 = vcmask 31744  }
 0x1f6   : > { %1034 = vmatpush1.msra.mxu0 %v726_v49  ;;  %v1898_v55 = vsel %vm1880_vm15, %v1894_v23, %v1896_v46 }
 0x1f7   : > { %2181 = vmatprep.subr.mxu1 %v1898_v55 }
 0x1f8   : > { %v680_v10 = vpop.permute.xlu0 %679 }
 0x1f9   : > { %v1892_v63 = vpop.permute.xlu1 %1891  ;;  %v684_v54 = vsel %vm683_vm5, %v4069_v27, %v680_v10 }
 0x1fa   : > { %v1897_v48 = vsel %vm1880_vm15, %v1892_v63, %v1894_v23 }
 0x1fb   : > { %2182 = vmatpush2.msra.mxu1 %v1897_v48 }
 0x1fc   : > { %v1853_v11 = vpop.permute.xlu0 %1852 }
 0x1fd   : > { %v682_v44 = vpop.permute.xlu1 %681 }
 0x1fe   : > { %v685_v51 = vsel %vm683_vm5, %v680_v10, %v682_v44 }
 0x1ff   : > { %1035 = vmatprep.subr.mxu0 %v685_v51 }
 0x200   : > { %1036 = vmatpush1.msra.mxu0 %v684_v54  ;;  %v1851_v37 = vpop.permute.xlu0 %1850 }
 0x201   : > { %1037 = vmatprep.subr.mxu0 %v643_v39  ;;  %v1855_v15 = vpop.permute.xlu1 %1854  ;;  %v1857_v26 = vsel %vm1856_vm6, %v1851_v37, %v1853_v11 }
 0x202   : > { %1038 = vmatpush1.msra.mxu0 %v642_v52  ;;  %v1858_v25 = vsel %vm1856_vm6, %v1853_v11, %v1855_v15 }
 0x203   : > { %2690 = vmatmul.mubr.msk.f32.vlgmr.msra.gmra.mxu0 %vm1003_vm7, %v978_v6  ;;  %2183 = vmatprep.subr.mxu1 %v1858_v25 }
 0x204   : > { %2184 = vmatpush2.msra.mxu1 %v1857_v26  ;;  %v1815_v24 = vpop.permute.xlu0 %1814  ;;  %2561 = vmatprep.mubr.f32.mxu0 %v4073_v31 }
 0x205   : > { %v1813_v30 = vpop.permute.xlu1 %1812 }
 0x206   : > { %v1817_v45 = vsel %vm971_vm2, %v1813_v30, %v1815_v24 }
 0x207   : > { %2185 = vmatprep.subr.mxu1 %v1817_v45 }
 0x208   : > { %v1774_v9 = vpop.permute.xlu0 %1773 }
 0x209   : > { %v1811_v1 = vpop.permute.xlu1 %1810 }
 0x20a   : > { %v1816_v38 = vsel %vm971_vm2, %v1811_v1, %v1813_v30 }
 0x20b   : > { %2186 = vmatpush2.msra.mxu1 %v1816_v38 }
 0x20c   : > { %v1772_v20 = vpop.permute.xlu0 %1771 }
 0x20d   : > { %v1776_v56 = vpop.permute.xlu1 %1775  ;;  %v1777_v60 = vsel %vm930_vm10, %v1772_v20, %v1774_v9 }
 0x20e   : > { %v1778_v33 = vsel %vm930_vm10, %v1774_v9, %v1776_v56 }
 0x20f   : > { %2187 = vmatprep.subr.mxu1 %v1778_v33 }
 0x210   : > { %2188 = vmatpush2.msra.mxu1 %v1777_v60  ;;  %v1737_v0 = vpop.permute.xlu0 %1736 }
 0x211   : > { %v1735_v2 = vpop.permute.xlu1 %1734 }
 0x212   : > { %v1739_v42 = vsel %vm889_vm9, %v1735_v2, %v1737_v0 }
 0x213   : > { %2189 = vmatprep.subr.mxu1 %v1739_v42 }
 0x214   : > { %v2487_v12 = vpop.permute.xlu0 %2486 }
 0x215   : > { %v2485_v53 = vpop.permute.xlu1 %2484 }
 0x216   : > { %v2489_v3 = vsel %vm807_vm13, %v2485_v53, %v2487_v12 }
 0x217   : > { %2725 = vmatprep.subr.msk.mxu0 %vm396_vm0, %v2489_v3 }
 0x218   : > { %v2483_v59 = vpop.permute.xlu0 %2482 }
 0x219   : > { %v2488_v50 = vsel %vm807_vm13, %v2483_v59, %v2485_v53  ;;  %v1733_v18 = vpop.permute.xlu1 %1732 }
 0x21a   : > { %v1738_v35 = vsel %vm889_vm9, %v1733_v18, %v1735_v2  ;;  %2726 = vmatpush1.msk.msra.mxu0 %vm396_vm0, %v2488_v50 }
 0x21b   : > { %2190 = vmatpush2.msra.mxu1 %v1738_v35  ;;  %2727 = vmatmul.mubr.msk.f32.vlgmr.msra.gmra.mxu0 %vm4074_vm1, %v2472_v17 }
 0x21c   : > { %2192 = vmatmul.mubr.f32.vlgmr.msra.gmra.mxu1 %v2066_v62 }
 0x225   : > { %v2122_v57 = vpop.permute.xlu0 %2121 }
 0x226   : > { %v1001_v36 = vpop.permute.xlu1 %1000 }
 0x229   : > { %v2574_v34 = vpop.permute.xlu0 %2573 }
 0x22a   : > { %v2477_v41 = vpop.permute.xlu1 %2476 }
 0x22d   : > { %v2578_v28 = vpop.permute.xlu0 %2577 }
 0x22e   : > { %v2576_v58 = vpop.permute.xlu1 %2575 }
 0x22f   : > { %v2579_v8 = vsel %vm807_vm13, %v2574_v34, %v2576_v58  ;;  %v2580_v16 = vsel %vm807_vm13, %v2576_v58, %v2578_v28 }
 0x230   : > { %2583 = vst [vmem:[%s4024_s12] sm:$0xf] %v2579_v8  ;;  %2584 = vst [vmem:[%s4024_s12 + $0x8] sm:$0xf] %v2580_v16 }
 0x2c3   : > { %v1073_v29 = vpop.f32.mrf.mxu0 }
 0x2c4   : > { %v1074_v4 = vadd.f32 %v1073_v29, %v1001_v36 }
 0x2c5   : > { %v1075_v22 = vpop.f32.mrf.mxu0 }
 0x2c6   : > { %v1078_v61 = vmax.f32 %v1074_v4, 0.0  ;;  %v1076_v7 = vadd.f32 %v1075_v22, %v1001_v36 }
 0x2c8   : > { %v2587_v43 = vrot.slane %v1078_v61, 4  ;;  %v1079_v14 = vmax.f32 %v1076_v7, 0.0 }
 0x2ca   : > { %2591 = vst [vmem:[%s4024_s12 + $0x10] ss:$-12 sps:$4 sm:$0xff] %v2587_v43   ;;  %v2588_v40 = vrot.slane %v1079_v14, 4 }
 0x2cc   : > { %2592 = vst [vmem:[%s4024_s12 + $0x18] ss:$-12 sps:$4 sm:$0xff] %v2588_v40  }
 0x2db   : > { %v2563_v23 = vpop.f32.mrf.mxu0 }
 0x2dc   : > { %v2193_v13 = vpop.f32.mrf.mxu1  ;;  %v2564_v21 = vadd.f32 %v2563_v23, %v2477_v41 }
 0x2dd   : > { %v2194_v32 = vadd.f32 %v2193_v13, %v2122_v57  ;;  %v2565_v49 = vpop.f32.mrf.mxu0 }
 0x2de   : > { %v2568_v46 = vmax.f32 %v2564_v21, 0.0  ;;  %v2195_v55 = vpop.f32.mrf.mxu1  ;;  %v2566_v10 = vadd.f32 %v2565_v49, %v2477_v41 }
 0x2df   : > { %v2198_v63 = vmax.f32 %v2194_v32, 0.0  ;;  %v2196_v48 = vadd.f32 %v2195_v55, %v2122_v57 }
 0x2e0   : > { %v2607_v11 = vrot.slane %v2568_v46, 4  ;;  %v2569_v44 = vmax.f32 %v2566_v10, 0.0 }
 0x2e1   : > { %v2597_v51 = vrot.slane %v2198_v63, 4  ;;  %v2199_v27 = vmax.f32 %v2196_v48, 0.0 }
 0x2e2   : > { %2611 = vst [vmem:[%s4024_s12 + $0x20] sm:$0xf0] %v2607_v11  ;;  %v2608_v54 = vrot.slane %v2569_v44, 4 }
 0x2e3   : > { %2601 = vst [vmem:[%s4024_s12 + $0x20] ss:$-12 sps:$4 sm:$0xff] %v2597_v51   ;;  %v2598_v37 = vrot.slane %v2199_v27, 4 }
 0x2e4   : > { %2612 = vst [vmem:[%s4024_s12 + $0x28] sm:$0xf0] %v2608_v54 }
 0x2e5   : > { %2602 = vst [vmem:[%s4024_s12 + $0x28] ss:$-12 sps:$4 sm:$0xff] %v2598_v37  }
 0x2e6 PF: > { %s20_s13 = sadd.s32 1, %s2818_s13  }
 0x2e7   : > { %p17_p4 = scmp.ge.s32.totalorder %s20_s13, 4  }
 0x2e9   :  { %19 = sbr.rel (!%p17_p4) target bundleno = 1 (0x1), region = 105 }

</bundles_post_ra>
